<compile_context>
chip_gen: v7x
topology: tpu7x:2x2x1
jax: 0.10.0
libtpu: 0.0.40
codegen_flags: <defaults>
</compile_context>

<pallas_src>
import jax
import jax.numpy as jnp
from jax.experimental import pallas as pl
from jax.experimental.pallas import tpu as pltpu

LANE = 128


def _round_up(n, m):
    return ((n + m - 1) // m) * m


# ----------------------- fused GRU-stack + Linear kernel -----------------------
def _make_fused_gru_kernel(B, T, Dp, H, Gp, num_layers):
    """Ref order: x, [w_ih, w_hh, b0, bhn] * L, fc_w, fc_b, out, gi_scratch, act_scratch."""

    def kernel(*refs):
        x_ref = refs[0]
        layer_refs = [refs[1 + 4 * l: 1 + 4 * (l + 1)] for l in range(num_layers)]
        fc_w_ref = refs[1 + 4 * num_layers]
        fc_b_ref = refs[2 + 4 * num_layers]
        out_ref = refs[3 + 4 * num_layers]
        gi_ref = refs[4 + 4 * num_layers]      # (T, B, Gp) f32 scratch: staged x-projection
        act_ref = refs[5 + 4 * num_layers]     # (T, B, H)  f32 scratch: inter-layer h's

        h = jnp.zeros((B, H), jnp.float32)
        for l, (w_ih_ref, w_hh_ref, b0_ref, bhn_ref) in enumerate(layer_refs):
            last = l == num_layers - 1

            # ---- hoisted input projection: ONE MXU matmul over all timesteps ----
            if l == 0:
                flat = x_ref[...]                                        # (T*B, Dp) bf16
            else:
                flat = act_ref[...].reshape(T * B, H).astype(jnp.bfloat16)
            gi_all = jnp.dot(flat, w_ih_ref[...],
                             preferred_element_type=jnp.float32) + b0_ref[...]
            gi_ref[...] = gi_all.reshape(T, B, Gp)                       # stage in VMEM

            # hoist the loop-invariant broadcast of b_hh_n (once per layer, not per step)
            bhn = jnp.broadcast_to(bhn_ref[...], (B, H))

            # ---- serial recurrence: only the small h-projection stays in the loop ----
            def step(t, h_c):
                gi_t = gi_ref[t]                                         # (B, Gp)
                gh = jnp.dot(h_c.astype(jnp.bfloat16), w_hh_ref[...],    # ref read at use
                             preferred_element_type=jnp.float32)         # (B, Gp)
                g = gi_t + gh
                r = jax.nn.sigmoid(g[:, 0:H])
                z = jax.nn.sigmoid(g[:, H:2 * H])
                n = jnp.tanh(gi_t[:, 2 * H:3 * H] + r * (gh[:, 2 * H:3 * H] + bhn))
                h_new = n + z * (h_c - n)                                # == (1-z)*n + z*h
                if not last:
                    act_ref[t] = h_new                  # time-major store, frees vregs
                return h_new

            h = jax.lax.fori_loop(0, T, step, jnp.zeros((B, H), jnp.float32),
                                  unroll=True)

        # ---- final Linear on the last timestep's hidden state only (lane-dense out) ----
        out_ref[...] = jnp.dot(h.astype(jnp.bfloat16), fc_w_ref[...],
                               preferred_element_type=jnp.float32) + fc_b_ref[...]

    return kernel


# --------------------------- parameter preparation -----------------------------
def prepare_kernel_params(raw, input_dim, hidden_dim, output_dim):
    """PyTorch-layout params -> packed, padded bf16 weights / f32 biases."""
    H = hidden_dim
    G = 3 * H
    Gp = _round_up(G, LANE)                 # packed gate width (NOT 3 * 128)
    Dp = _round_up(input_dim, 16)           # bf16 sublane-friendly contraction dim
    Op = _round_up(output_dim, LANE)        # lane-dense output width

    layers = []
    for li, (w_ih, w_hh, b_ih, b_hh) in enumerate(raw["layers"]):
        d_in = w_ih.shape[1]
        rows = Dp if li == 0 else H         # contraction dim matches the layer's input
        w_ih_p = jnp.zeros((rows, Gp), jnp.float32).at[:d_in, :G].set(w_ih.T)
        w_hh_p = jnp.zeros((H, Gp), jnp.float32).at[:, :G].set(w_hh.T)
        # fold b_hh for r/z into the hoisted bias; keep b_hh_n (needed inside r*(...))
        b0 = b_ih + jnp.concatenate([b_hh[:2 * H], jnp.zeros((H,), b_hh.dtype)])
        b0_p = jnp.zeros((1, Gp), jnp.float32).at[0, :G].set(b0)
        bhn_p = b_hh[2 * H:].reshape(1, H).astype(jnp.float32)
        layers.append((w_ih_p.astype(jnp.bfloat16), w_hh_p.astype(jnp.bfloat16),
                       b0_p, bhn_p))

    fc_w_p = jnp.zeros((H, Op), jnp.float32).at[:, :output_dim].set(raw["fc_w"].T)
    fc_w_p = fc_w_p.astype(jnp.bfloat16)
    fc_b_p = jnp.zeros((1, Op), jnp.float32).at[0, :output_dim].set(raw["fc_b"])
    return layers, fc_w_p, fc_b_p, Gp, Dp, Op


# --------------------------------- forward -------------------------------------
def gru_model_forward(raw, x):
    """x: (B, T, input_dim) batch-first (nn.GRU(batch_first=True)) -> (B, output_dim)."""
    B, T, D = x.shape
    num_layers = len(raw["layers"])
    hidden_dim = raw["layers"][0][1].shape[1]          # w_hh: (3H, H)
    output_dim = raw["fc_w"].shape[0]

    layers, fc_w, fc_b, Gp, Dp, Op = prepare_kernel_params(raw, D, hidden_dim, output_dim)

    # time-major, feature-padded, bf16 input (tiny wrapper-side transpose/pad, outside
    # the kernel) so the layer-0 hoisted projection directly yields time-major gi.
    x_tm = jnp.transpose(x, (1, 0, 2))
    x_tm = jnp.pad(x_tm, ((0, 0), (0, 0), (0, Dp - D)))
    x_tm = x_tm.reshape(T * B, Dp).astype(jnp.bfloat16)

    flat_inputs = [x_tm]
    for lp in layers:
        flat_inputs.extend(lp)
    flat_inputs.extend([fc_w, fc_b])

    vmem = pl.BlockSpec(memory_space=pltpu.MemorySpace.VMEM)
    out_pad = pl.pallas_call(
        _make_fused_gru_kernel(B, T, Dp, hidden_dim, Gp, num_layers),
        out_shape=jax.ShapeDtypeStruct((B, Op), jnp.float32),
        in_specs=[vmem] * len(flat_inputs),
        out_specs=vmem,
        scratch_shapes=[
            pltpu.VMEM((T, B, Gp), jnp.float32),        # staged input projections
            pltpu.VMEM((T, B, hidden_dim), jnp.float32)  # inter-layer activations
        ],
        compiler_params=pltpu.CompilerParams(vmem_limit_bytes=32 * 1024 * 1024),
    )(*flat_inputs)
    return out_pad[:, :output_dim]


# ------------------------- parameter init (PyTorch-style) -----------------------
def init_params(key, input_dim, hidden_dim, output_dim, num_layers):
    """nn.GRU / nn.Linear shaped params, uniform(-1/sqrt(H), 1/sqrt(H))."""
    k = 1.0 / jnp.sqrt(jnp.float32(hidden_dim))
    layers = []
    for layer in range(num_layers):
        d_in = input_dim if layer == 0 else hidden_dim
        key, k1, k2, k3, k4 = jax.random.split(key, 5)
        w_ih = jax.random.uniform(k1, (3 * hidden_dim, d_in), jnp.float32, -k, k)
        w_hh = jax.random.uniform(k2, (3 * hidden_dim, hidden_dim), jnp.float32, -k, k)
        b_ih = jax.random.uniform(k3, (3 * hidden_dim,), jnp.float32, -k, k)
        b_hh = jax.random.uniform(k4, (3 * hidden_dim,), jnp.float32, -k, k)
        layers.append((w_ih, w_hh, b_ih, b_hh))
    key, k1, k2 = jax.random.split(key, 3)
    fc_w = jax.random.uniform(k1, (output_dim, hidden_dim), jnp.float32, -k, k)
    fc_b = jax.random.uniform(k2, (output_dim,), jnp.float32, -k, k)
    return {"layers": layers, "fc_w": fc_w, "fc_b": fc_b}


# ------------------------------ pure-JAX reference ------------------------------
def gru_model_ref(raw, x, matmul_dtype=jnp.float32):
    """PyTorch-semantics reference. matmul_dtype=bf16 mirrors the kernel's MXU numerics."""
    def mm(a, b):
        return jnp.dot(a.astype(matmul_dtype), b.astype(matmul_dtype),
                       preferred_element_type=jnp.float32)

    B, T, _ = x.shape
    h_seq = x.astype(jnp.float32)
    h = None
    for (w_ih, w_hh, b_ih, b_hh) in raw["layers"]:
        H = w_hh.shape[1]
        h = jnp.zeros((B, H), jnp.float32)
        outs = []
        for t in range(T):
            gi = mm(h_seq[:, t, :], w_ih.T) + b_ih
            gh = mm(h, w_hh.T) + b_hh
            r = jax.nn.sigmoid(gi[:, :H] + gh[:, :H])
            z = jax.nn.sigmoid(gi[:, H:2 * H] + gh[:, H:2 * H])
            n = jnp.tanh(gi[:, 2 * H:] + r * gh[:, 2 * H:])
            h = (1.0 - z) * n + z * h
            outs.append(h)
        h_seq = jnp.stack(outs, axis=1)
    return mm(h, raw["fc_w"].T) + raw["fc_b"]


# ----------------------------------- main ---------------------------------------
if __name__ == "__main__":
    B, T = 2, 8
    input_dim, hidden_dim, output_dim, num_layers = 4, 32, 3, 2

    key = jax.random.PRNGKey(0)
    kp, kx = jax.random.split(key)
    raw = init_params(kp, input_dim, hidden_dim, output_dim, num_layers)
    x = jax.random.normal(kx, (B, T, input_dim), jnp.float32)

    fwd = jax.jit(gru_model_forward)
    out = jax.block_until_ready(fwd(raw, x))
    assert out.shape == (B, output_dim), out.shape

    # Tight check against a reference mirroring the kernel numerics
    # (bf16 MXU inputs, f32 accumulation, f32 gate math / carried state).
    ref_bf16 = jax.block_until_ready(gru_model_ref(raw, x, jnp.bfloat16))
    assert jnp.allclose(out, ref_bf16, atol=5e-3, rtol=5e-3), (out, ref_bf16)

    # Coarse sanity check against the full-f32 PyTorch-semantics reference
    # (difference is bf16 matmul precision compounding over T steps / layers).
    ref_f32 = jax.block_until_ready(gru_model_ref(raw, x, jnp.float32))
    assert jnp.allclose(out, ref_f32, atol=5e-2, rtol=5e-2), (out, ref_f32)

    print("KERNEL_OK")
</pallas_src>

<mosaic_0001>
module attributes {stable_mosaic.version = 11 : i64} {
  func.func @kernel(%arg0: memref<16x16xbf16, #tpu.memory_space<vmem>>, %arg1: memref<16x128xbf16, #tpu.memory_space<vmem>>, %arg2: memref<32x128xbf16, #tpu.memory_space<vmem>>, %arg3: memref<1x128xf32, #tpu.memory_space<vmem>>, %arg4: memref<1x32xf32, #tpu.memory_space<vmem>>, %arg5: memref<32x128xbf16, #tpu.memory_space<vmem>>, %arg6: memref<32x128xbf16, #tpu.memory_space<vmem>>, %arg7: memref<1x128xf32, #tpu.memory_space<vmem>>, %arg8: memref<1x32xf32, #tpu.memory_space<vmem>>, %arg9: memref<32x128xbf16, #tpu.memory_space<vmem>>, %arg10: memref<1x128xf32, #tpu.memory_space<vmem>>, %arg11: memref<2x128xf32, #tpu.memory_space<vmem>>, %arg12: memref<8x2x128xf32, #tpu.memory_space<vmem>>, %arg13: memref<8x2x32xf32, #tpu.memory_space<vmem>>) attributes {dimension_semantics = [], scalar_prefetch = 0 : i64, scratch_operands = 2 : i64, tpu.core_type = #tpu.core_type<tc>} {
    %c0 = arith.constant 0 : index
    %c0_0 = arith.constant 0 : index
    %0 = vector.load %arg0[%c0, %c0_0] : memref<16x16xbf16, #tpu.memory_space<vmem>>, vector<16x16xbf16>
    %c0_1 = arith.constant 0 : index
    %c0_2 = arith.constant 0 : index
    %1 = vector.load %arg1[%c0_1, %c0_2] : memref<16x128xbf16, #tpu.memory_space<vmem>>, vector<16x128xbf16>
    %cst = arith.constant dense<0.000000e+00> : vector<16x128xf32>
    %2 = tpu.matmul %0, %1, %cst {dimension_numbers = #tpu.dot_dimension_numbers<[1], [0], [0], [1], [0, 0, 1, 1], [], []>} : vector<16x16xbf16>, vector<16x128xbf16>, vector<16x128xf32> -> vector<16x128xf32>
    %c0_3 = arith.constant 0 : index
    %c0_4 = arith.constant 0 : index
    %3 = vector.load %arg3[%c0_3, %c0_4] : memref<1x128xf32, #tpu.memory_space<vmem>>, vector<1x128xf32>
    %4 = vector.broadcast %3 : vector<1x128xf32> to vector<16x128xf32>
    %5 = arith.addf %2, %4 : vector<16x128xf32>
    %6 = vector.shape_cast %5 : vector<16x128xf32> to vector<8x2x128xf32>
    %c0_5 = arith.constant 0 : index
    %c0_6 = arith.constant 0 : index
    %c0_7 = arith.constant 0 : index
    %7 = vector.load %arg12[%c0_5, %c0_6, %c0_7] : memref<8x2x128xf32, #tpu.memory_space<vmem>>, vector<8x2x128xf32>
    tpu.vector_store %arg12[%c0_5, %c0_6, %c0_7], %6 {strides = array<i32>} : memref<8x2x128xf32, #tpu.memory_space<vmem>>, vector<8x2x128xf32>,
    %c0_8 = arith.constant 0 : index
    %c0_9 = arith.constant 0 : index
    %8 = vector.load %arg4[%c0_8, %c0_9] : memref<1x32xf32, #tpu.memory_space<vmem>>, vector<1x32xf32>
    %9 = vector.shape_cast %8 : vector<1x32xf32> to vector<1x32xf32>
    %10 = vector.broadcast %9 : vector<1x32xf32> to vector<2x32xf32>
    %cst_10 = arith.constant 0.000000e+00 : f32
    %11 = vector.broadcast %cst_10 : f32 to vector<2x32xf32>
    %c0_i32 = arith.constant 0 : i32
    %12 = arith.index_cast %c0_i32 : i32 to index
    %c0_11 = arith.constant 0 : index
    %c0_12 = arith.constant 0 : index
    %13 = vector.load %arg12[%12, %c0_11, %c0_12] : memref<8x2x128xf32, #tpu.memory_space<vmem>>, vector<1x2x128xf32>
    %14 = vector.shape_cast %13 : vector<1x2x128xf32> to vector<2x128xf32>
    %15 = arith.truncf %11 : vector<2x32xf32> to vector<2x32xbf16>
    %c0_13 = arith.constant 0 : index
    %c0_14 = arith.constant 0 : index
    %16 = vector.load %arg2[%c0_13, %c0_14] : memref<32x128xbf16, #tpu.memory_space<vmem>>, vector<32x128xbf16>
    %cst_15 = arith.constant dense<0.000000e+00> : vector<2x128xf32>
    %17 = tpu.matmul %15, %16, %cst_15 {dimension_numbers = #tpu.dot_dimension_numbers<[1], [0], [0], [1], [0, 0, 1, 1], [], []>} : vector<2x32xbf16>, vector<32x128xbf16>, vector<2x128xf32> -> vector<2x128xf32>
    %18 = arith.addf %14, %17 : vector<2x128xf32>
    %19 = vector.extract_strided_slice %18 {offsets = [0, 0], sizes = [2, 32], strides = [1, 1]} : vector<2x128xf32> to vector<2x32xf32>
    %20 = arith.negf %19 : vector<2x32xf32>
    %21 = math.exp %20 : vector<2x32xf32>
    %cst_16 = arith.constant 1.000000e+00 : f32
    %22 = vector.broadcast %cst_16 : f32 to vector<2x32xf32>
    %23 = arith.addf %22, %21 : vector<2x32xf32>
    %24 = arith.divf %22, %23 : vector<2x32xf32>
    %25 = vector.extract_strided_slice %18 {offsets = [0, 32], sizes = [2, 32], strides = [1, 1]} : vector<2x128xf32> to vector<2x32xf32>
    %26 = arith.negf %25 : vector<2x32xf32>
    %27 = math.exp %26 : vector<2x32xf32>
    %cst_17 = arith.constant 1.000000e+00 : f32
    %28 = vector.broadcast %cst_17 : f32 to vector<2x32xf32>
    %29 = arith.addf %28, %27 : vector<2x32xf32>
    %30 = arith.divf %28, %29 : vector<2x32xf32>
    %31 = vector.extract_strided_slice %14 {offsets = [0, 64], sizes = [2, 32], strides = [1, 1]} : vector<2x128xf32> to vector<2x32xf32>
    %32 = vector.extract_strided_slice %17 {offsets = [0, 64], sizes = [2, 32], strides = [1, 1]} : vector<2x128xf32> to vector<2x32xf32>
    %33 = arith.addf %32, %10 : vector<2x32xf32>
    %34 = arith.mulf %24, %33 : vector<2x32xf32>
    %35 = arith.addf %31, %34 : vector<2x32xf32>
    %36 = math.tanh %35 : vector<2x32xf32>
    %37 = arith.subf %11, %36 : vector<2x32xf32>
    %38 = arith.mulf %30, %37 : vector<2x32xf32>
    %39 = arith.addf %36, %38 : vector<2x32xf32>
    %40 = arith.index_cast %c0_i32 : i32 to index
    %c0_18 = arith.constant 0 : index
    %c0_19 = arith.constant 0 : index
    %41 = vector.load %arg13[%40, %c0_18, %c0_19] : memref<8x2x32xf32, #tpu.memory_space<vmem>>, vector<1x2x32xf32>
    %42 = vector.shape_cast %41 : vector<1x2x32xf32> to vector<2x32xf32>
    %43 = vector.shape_cast %39 : vector<2x32xf32> to vector<1x2x32xf32>
    tpu.vector_store %arg13[%40, %c0_18, %c0_19], %43 {strides = array<i32>} : memref<8x2x32xf32, #tpu.memory_space<vmem>>, vector<1x2x32xf32>,
    %c1_i32 = arith.constant 1 : i32
    %44 = arith.index_cast %c1_i32 : i32 to index
    %c0_20 = arith.constant 0 : index
    %c0_21 = arith.constant 0 : index
    %45 = vector.load %arg12[%44, %c0_20, %c0_21] : memref<8x2x128xf32, #tpu.memory_space<vmem>>, vector<1x2x128xf32>
    %46 = vector.shape_cast %45 : vector<1x2x128xf32> to vector<2x128xf32>
    %47 = arith.truncf %39 : vector<2x32xf32> to vector<2x32xbf16>
    %c0_22 = arith.constant 0 : index
    %c0_23 = arith.constant 0 : index
    %48 = vector.load %arg2[%c0_22, %c0_23] : memref<32x128xbf16, #tpu.memory_space<vmem>>, vector<32x128xbf16>
    %cst_24 = arith.constant dense<0.000000e+00> : vector<2x128xf32>
    %49 = tpu.matmul %47, %48, %cst_24 {dimension_numbers = #tpu.dot_dimension_numbers<[1], [0], [0], [1], [0, 0, 1, 1], [], []>} : vector<2x32xbf16>, vector<32x128xbf16>, vector<2x128xf32> -> vector<2x128xf32>
    %50 = arith.addf %46, %49 : vector<2x128xf32>
    %51 = vector.extract_strided_slice %50 {offsets = [0, 0], sizes = [2, 32], strides = [1, 1]} : vector<2x128xf32> to vector<2x32xf32>
    %52 = arith.negf %51 : vector<2x32xf32>
    %53 = math.exp %52 : vector<2x32xf32>
    %cst_25 = arith.constant 1.000000e+00 : f32
    %54 = vector.broadcast %cst_25 : f32 to vector<2x32xf32>
    %55 = arith.addf %54, %53 : vector<2x32xf32>
    %56 = arith.divf %54, %55 : vector<2x32xf32>
    %57 = vector.extract_strided_slice %50 {offsets = [0, 32], sizes = [2, 32], strides = [1, 1]} : vector<2x128xf32> to vector<2x32xf32>
    %58 = arith.negf %57 : vector<2x32xf32>
    %59 = math.exp %58 : vector<2x32xf32>
    %cst_26 = arith.constant 1.000000e+00 : f32
    %60 = vector.broadcast %cst_26 : f32 to vector<2x32xf32>
    %61 = arith.addf %60, %59 : vector<2x32xf32>
    %62 = arith.divf %60, %61 : vector<2x32xf32>
    %63 = vector.extract_strided_slice %46 {offsets = [0, 64], sizes = [2, 32], strides = [1, 1]} : vector<2x128xf32> to vector<2x32xf32>
    %64 = vector.extract_strided_slice %49 {offsets = [0, 64], sizes = [2, 32], strides = [1, 1]} : vector<2x128xf32> to vector<2x32xf32>
    %65 = arith.addf %64, %10 : vector<2x32xf32>
    %66 = arith.mulf %56, %65 : vector<2x32xf32>
    %67 = arith.addf %63, %66 : vector<2x32xf32>
    %68 = math.tanh %67 : vector<2x32xf32>
    %69 = arith.subf %39, %68 : vector<2x32xf32>
    %70 = arith.mulf %62, %69 : vector<2x32xf32>
    %71 = arith.addf %68, %70 : vector<2x32xf32>
    %72 = arith.index_cast %c1_i32 : i32 to index
    %c0_27 = arith.constant 0 : index
    %c0_28 = arith.constant 0 : index
    %73 = vector.load %arg13[%72, %c0_27, %c0_28] : memref<8x2x32xf32, #tpu.memory_space<vmem>>, vector<1x2x32xf32>
    %74 = vector.shape_cast %73 : vector<1x2x32xf32> to vector<2x32xf32>
    %75 = vector.shape_cast %71 : vector<2x32xf32> to vector<1x2x32xf32>
    tpu.vector_store %arg13[%72, %c0_27, %c0_28], %75 {strides = array<i32>} : memref<8x2x32xf32, #tpu.memory_space<vmem>>, vector<1x2x32xf32>,
    %c2_i32 = arith.constant 2 : i32
    %76 = arith.index_cast %c2_i32 : i32 to index
    %c0_29 = arith.constant 0 : index
    %c0_30 = arith.constant 0 : index
    %77 = vector.load %arg12[%76, %c0_29, %c0_30] : memref<8x2x128xf32, #tpu.memory_space<vmem>>, vector<1x2x128xf32>
    %78 = vector.shape_cast %77 : vector<1x2x128xf32> to vector<2x128xf32>
    %79 = arith.truncf %71 : vector<2x32xf32> to vector<2x32xbf16>
    %c0_31 = arith.constant 0 : index
    %c0_32 = arith.constant 0 : index
    %80 = vector.load %arg2[%c0_31, %c0_32] : memref<32x128xbf16, #tpu.memory_space<vmem>>, vector<32x128xbf16>
    %cst_33 = arith.constant dense<0.000000e+00> : vector<2x128xf32>
    %81 = tpu.matmul %79, %80, %cst_33 {dimension_numbers = #tpu.dot_dimension_numbers<[1], [0], [0], [1], [0, 0, 1, 1], [], []>} : vector<2x32xbf16>, vector<32x128xbf16>, vector<2x128xf32> -> vector<2x128xf32>
    %82 = arith.addf %78, %81 : vector<2x128xf32>
    %83 = vector.extract_strided_slice %82 {offsets = [0, 0], sizes = [2, 32], strides = [1, 1]} : vector<2x128xf32> to vector<2x32xf32>
    %84 = arith.negf %83 : vector<2x32xf32>
    %85 = math.exp %84 : vector<2x32xf32>
    %cst_34 = arith.constant 1.000000e+00 : f32
    %86 = vector.broadcast %cst_34 : f32 to vector<2x32xf32>
    %87 = arith.addf %86, %85 : vector<2x32xf32>
    %88 = arith.divf %86, %87 : vector<2x32xf32>
    %89 = vector.extract_strided_slice %82 {offsets = [0, 32], sizes = [2, 32], strides = [1, 1]} : vector<2x128xf32> to vector<2x32xf32>
    %90 = arith.negf %89 : vector<2x32xf32>
    %91 = math.exp %90 : vector<2x32xf32>
    %cst_35 = arith.constant 1.000000e+00 : f32
    %92 = vector.broadcast %cst_35 : f32 to vector<2x32xf32>
    %93 = arith.addf %92, %91 : vector<2x32xf32>
    %94 = arith.divf %92, %93 : vector<2x32xf32>
    %95 = vector.extract_strided_slice %78 {offsets = [0, 64], sizes = [2, 32], strides = [1, 1]} : vector<2x128xf32> to vector<2x32xf32>
    %96 = vector.extract_strided_slice %81 {offsets = [0, 64], sizes = [2, 32], strides = [1, 1]} : vector<2x128xf32> to vector<2x32xf32>
    %97 = arith.addf %96, %10 : vector<2x32xf32>
    %98 = arith.mulf %88, %97 : vector<2x32xf32>
    %99 = arith.addf %95, %98 : vector<2x32xf32>
    %100 = math.tanh %99 : vector<2x32xf32>
    %101 = arith.subf %71, %100 : vector<2x32xf32>
    %102 = arith.mulf %94, %101 : vector<2x32xf32>
    %103 = arith.addf %100, %102 : vector<2x32xf32>
    %104 = arith.index_cast %c2_i32 : i32 to index
    %c0_36 = arith.constant 0 : index
    %c0_37 = arith.constant 0 : index
    %105 = vector.load %arg13[%104, %c0_36, %c0_37] : memref<8x2x32xf32, #tpu.memory_space<vmem>>, vector<1x2x32xf32>
    %106 = vector.shape_cast %105 : vector<1x2x32xf32> to vector<2x32xf32>
    %107 = vector.shape_cast %103 : vector<2x32xf32> to vector<1x2x32xf32>
    tpu.vector_store %arg13[%104, %c0_36, %c0_37], %107 {strides = array<i32>} : memref<8x2x32xf32, #tpu.memory_space<vmem>>, vector<1x2x32xf32>,
    %c3_i32 = arith.constant 3 : i32
    %108 = arith.index_cast %c3_i32 : i32 to index
    %c0_38 = arith.constant 0 : index
    %c0_39 = arith.constant 0 : index
    %109 = vector.load %arg12[%108, %c0_38, %c0_39] : memref<8x2x128xf32, #tpu.memory_space<vmem>>, vector<1x2x128xf32>
    %110 = vector.shape_cast %109 : vector<1x2x128xf32> to vector<2x128xf32>
    %111 = arith.truncf %103 : vector<2x32xf32> to vector<2x32xbf16>
    %c0_40 = arith.constant 0 : index
    %c0_41 = arith.constant 0 : index
    %112 = vector.load %arg2[%c0_40, %c0_41] : memref<32x128xbf16, #tpu.memory_space<vmem>>, vector<32x128xbf16>
    %cst_42 = arith.constant dense<0.000000e+00> : vector<2x128xf32>
    %113 = tpu.matmul %111, %112, %cst_42 {dimension_numbers = #tpu.dot_dimension_numbers<[1], [0], [0], [1], [0, 0, 1, 1], [], []>} : vector<2x32xbf16>, vector<32x128xbf16>, vector<2x128xf32> -> vector<2x128xf32>
    %114 = arith.addf %110, %113 : vector<2x128xf32>
    %115 = vector.extract_strided_slice %114 {offsets = [0, 0], sizes = [2, 32], strides = [1, 1]} : vector<2x128xf32> to vector<2x32xf32>
    %116 = arith.negf %115 : vector<2x32xf32>
    %117 = math.exp %116 : vector<2x32xf32>
    %cst_43 = arith.constant 1.000000e+00 : f32
    %118 = vector.broadcast %cst_43 : f32 to vector<2x32xf32>
    %119 = arith.addf %118, %117 : vector<2x32xf32>
    %120 = arith.divf %118, %119 : vector<2x32xf32>
    %121 = vector.extract_strided_slice %114 {offsets = [0, 32], sizes = [2, 32], strides = [1, 1]} : vector<2x128xf32> to vector<2x32xf32>
    %122 = arith.negf %121 : vector<2x32xf32>
    %123 = math.exp %122 : vector<2x32xf32>
    %cst_44 = arith.constant 1.000000e+00 : f32
    %124 = vector.broadcast %cst_44 : f32 to vector<2x32xf32>
    %125 = arith.addf %124, %123 : vector<2x32xf32>
    %126 = arith.divf %124, %125 : vector<2x32xf32>
    %127 = vector.extract_strided_slice %110 {offsets = [0, 64], sizes = [2, 32], strides = [1, 1]} : vector<2x128xf32> to vector<2x32xf32>
    %128 = vector.extract_strided_slice %113 {offsets = [0, 64], sizes = [2, 32], strides = [1, 1]} : vector<2x128xf32> to vector<2x32xf32>
    %129 = arith.addf %128, %10 : vector<2x32xf32>
    %130 = arith.mulf %120, %129 : vector<2x32xf32>
    %131 = arith.addf %127, %130 : vector<2x32xf32>
    %132 = math.tanh %131 : vector<2x32xf32>
    %133 = arith.subf %103, %132 : vector<2x32xf32>
    %134 = arith.mulf %126, %133 : vector<2x32xf32>
    %135 = arith.addf %132, %134 : vector<2x32xf32>
    %136 = arith.index_cast %c3_i32 : i32 to index
    %c0_45 = arith.constant 0 : index
    %c0_46 = arith.constant 0 : index
    %137 = vector.load %arg13[%136, %c0_45, %c0_46] : memref<8x2x32xf32, #tpu.memory_space<vmem>>, vector<1x2x32xf32>
    %138 = vector.shape_cast %137 : vector<1x2x32xf32> to vector<2x32xf32>
    %139 = vector.shape_cast %135 : vector<2x32xf32> to vector<1x2x32xf32>
    tpu.vector_store %arg13[%136, %c0_45, %c0_46], %139 {strides = array<i32>} : memref<8x2x32xf32, #tpu.memory_space<vmem>>, vector<1x2x32xf32>,
    %c4_i32 = arith.constant 4 : i32
    %140 = arith.index_cast %c4_i32 : i32 to index
    %c0_47 = arith.constant 0 : index
    %c0_48 = arith.constant 0 : index
    %141 = vector.load %arg12[%140, %c0_47, %c0_48] : memref<8x2x128xf32, #tpu.memory_space<vmem>>, vector<1x2x128xf32>
    %142 = vector.shape_cast %141 : vector<1x2x128xf32> to vector<2x128xf32>
    %143 = arith.truncf %135 : vector<2x32xf32> to vector<2x32xbf16>
    %c0_49 = arith.constant 0 : index
    %c0_50 = arith.constant 0 : index
    %144 = vector.load %arg2[%c0_49, %c0_50] : memref<32x128xbf16, #tpu.memory_space<vmem>>, vector<32x128xbf16>
    %cst_51 = arith.constant dense<0.000000e+00> : vector<2x128xf32>
    %145 = tpu.matmul %143, %144, %cst_51 {dimension_numbers = #tpu.dot_dimension_numbers<[1], [0], [0], [1], [0, 0, 1, 1], [], []>} : vector<2x32xbf16>, vector<32x128xbf16>, vector<2x128xf32> -> vector<2x128xf32>
    %146 = arith.addf %142, %145 : vector<2x128xf32>
    %147 = vector.extract_strided_slice %146 {offsets = [0, 0], sizes = [2, 32], strides = [1, 1]} : vector<2x128xf32> to vector<2x32xf32>
    %148 = arith.negf %147 : vector<2x32xf32>
    %149 = math.exp %148 : vector<2x32xf32>
    %cst_52 = arith.constant 1.000000e+00 : f32
    %150 = vector.broadcast %cst_52 : f32 to vector<2x32xf32>
    %151 = arith.addf %150, %149 : vector<2x32xf32>
    %152 = arith.divf %150, %151 : vector<2x32xf32>
    %153 = vector.extract_strided_slice %146 {offsets = [0, 32], sizes = [2, 32], strides = [1, 1]} : vector<2x128xf32> to vector<2x32xf32>
    %154 = arith.negf %153 : vector<2x32xf32>
    %155 = math.exp %154 : vector<2x32xf32>
    %cst_53 = arith.constant 1.000000e+00 : f32
    %156 = vector.broadcast %cst_53 : f32 to vector<2x32xf32>
    %157 = arith.addf %156, %155 : vector<2x32xf32>
    %158 = arith.divf %156, %157 : vector<2x32xf32>
    %159 = vector.extract_strided_slice %142 {offsets = [0, 64], sizes = [2, 32], strides = [1, 1]} : vector<2x128xf32> to vector<2x32xf32>
    %160 = vector.extract_strided_slice %145 {offsets = [0, 64], sizes = [2, 32], strides = [1, 1]} : vector<2x128xf32> to vector<2x32xf32>
    %161 = arith.addf %160, %10 : vector<2x32xf32>
    %162 = arith.mulf %152, %161 : vector<2x32xf32>
    %163 = arith.addf %159, %162 : vector<2x32xf32>
    %164 = math.tanh %163 : vector<2x32xf32>
    %165 = arith.subf %135, %164 : vector<2x32xf32>
    %166 = arith.mulf %158, %165 : vector<2x32xf32>
    %167 = arith.addf %164, %166 : vector<2x32xf32>
    %168 = arith.index_cast %c4_i32 : i32 to index
    %c0_54 = arith.constant 0 : index
    %c0_55 = arith.constant 0 : index
    %169 = vector.load %arg13[%168, %c0_54, %c0_55] : memref<8x2x32xf32, #tpu.memory_space<vmem>>, vector<1x2x32xf32>
    %170 = vector.shape_cast %169 : vector<1x2x32xf32> to vector<2x32xf32>
    %171 = vector.shape_cast %167 : vector<2x32xf32> to vector<1x2x32xf32>
    tpu.vector_store %arg13[%168, %c0_54, %c0_55], %171 {strides = array<i32>} : memref<8x2x32xf32, #tpu.memory_space<vmem>>, vector<1x2x32xf32>,
    %c5_i32 = arith.constant 5 : i32
    %172 = arith.index_cast %c5_i32 : i32 to index
    %c0_56 = arith.constant 0 : index
    %c0_57 = arith.constant 0 : index
    %173 = vector.load %arg12[%172, %c0_56, %c0_57] : memref<8x2x128xf32, #tpu.memory_space<vmem>>, vector<1x2x128xf32>
    %174 = vector.shape_cast %173 : vector<1x2x128xf32> to vector<2x128xf32>
    %175 = arith.truncf %167 : vector<2x32xf32> to vector<2x32xbf16>
    %c0_58 = arith.constant 0 : index
    %c0_59 = arith.constant 0 : index
    %176 = vector.load %arg2[%c0_58, %c0_59] : memref<32x128xbf16, #tpu.memory_space<vmem>>, vector<32x128xbf16>
    %cst_60 = arith.constant dense<0.000000e+00> : vector<2x128xf32>
    %177 = tpu.matmul %175, %176, %cst_60 {dimension_numbers = #tpu.dot_dimension_numbers<[1], [0], [0], [1], [0, 0, 1, 1], [], []>} : vector<2x32xbf16>, vector<32x128xbf16>, vector<2x128xf32> -> vector<2x128xf32>
    %178 = arith.addf %174, %177 : vector<2x128xf32>
    %179 = vector.extract_strided_slice %178 {offsets = [0, 0], sizes = [2, 32], strides = [1, 1]} : vector<2x128xf32> to vector<2x32xf32>
    %180 = arith.negf %179 : vector<2x32xf32>
    %181 = math.exp %180 : vector<2x32xf32>
    %cst_61 = arith.constant 1.000000e+00 : f32
    %182 = vector.broadcast %cst_61 : f32 to vector<2x32xf32>
    %183 = arith.addf %182, %181 : vector<2x32xf32>
    %184 = arith.divf %182, %183 : vector<2x32xf32>
    %185 = vector.extract_strided_slice %178 {offsets = [0, 32], sizes = [2, 32], strides = [1, 1]} : vector<2x128xf32> to vector<2x32xf32>
    %186 = arith.negf %185 : vector<2x32xf32>
    %187 = math.exp %186 : vector<2x32xf32>
    %cst_62 = arith.constant 1.000000e+00 : f32
    %188 = vector.broadcast %cst_62 : f32 to vector<2x32xf32>
    %189 = arith.addf %188, %187 : vector<2x32xf32>
    %190 = arith.divf %188, %189 : vector<2x32xf32>
    %191 = vector.extract_strided_slice %174 {offsets = [0, 64], sizes = [2, 32], strides = [1, 1]} : vector<2x128xf32> to vector<2x32xf32>
    %192 = vector.extract_strided_slice %177 {offsets = [0, 64], sizes = [2, 32], strides = [1, 1]} : vector<2x128xf32> to vector<2x32xf32>
    %193 = arith.addf %192, %10 : vector<2x32xf32>
    %194 = arith.mulf %184, %193 : vector<2x32xf32>
    %195 = arith.addf %191, %194 : vector<2x32xf32>
    %196 = math.tanh %195 : vector<2x32xf32>
    %197 = arith.subf %167, %196 : vector<2x32xf32>
    %198 = arith.mulf %190, %197 : vector<2x32xf32>
    %199 = arith.addf %196, %198 : vector<2x32xf32>
    %200 = arith.index_cast %c5_i32 : i32 to index
    %c0_63 = arith.constant 0 : index
    %c0_64 = arith.constant 0 : index
    %201 = vector.load %arg13[%200, %c0_63, %c0_64] : memref<8x2x32xf32, #tpu.memory_space<vmem>>, vector<1x2x32xf32>
    %202 = vector.shape_cast %201 : vector<1x2x32xf32> to vector<2x32xf32>
    %203 = vector.shape_cast %199 : vector<2x32xf32> to vector<1x2x32xf32>
    tpu.vector_store %arg13[%200, %c0_63, %c0_64], %203 {strides = array<i32>} : memref<8x2x32xf32, #tpu.memory_space<vmem>>, vector<1x2x32xf32>,
    %c6_i32 = arith.constant 6 : i32
    %204 = arith.index_cast %c6_i32 : i32 to index
    %c0_65 = arith.constant 0 : index
    %c0_66 = arith.constant 0 : index
    %205 = vector.load %arg12[%204, %c0_65, %c0_66] : memref<8x2x128xf32, #tpu.memory_space<vmem>>, vector<1x2x128xf32>
    %206 = vector.shape_cast %205 : vector<1x2x128xf32> to vector<2x128xf32>
    %207 = arith.truncf %199 : vector<2x32xf32> to vector<2x32xbf16>
    %c0_67 = arith.constant 0 : index
    %c0_68 = arith.constant 0 : index
    %208 = vector.load %arg2[%c0_67, %c0_68] : memref<32x128xbf16, #tpu.memory_space<vmem>>, vector<32x128xbf16>
    %cst_69 = arith.constant dense<0.000000e+00> : vector<2x128xf32>
    %209 = tpu.matmul %207, %208, %cst_69 {dimension_numbers = #tpu.dot_dimension_numbers<[1], [0], [0], [1], [0, 0, 1, 1], [], []>} : vector<2x32xbf16>, vector<32x128xbf16>, vector<2x128xf32> -> vector<2x128xf32>
    %210 = arith.addf %206, %209 : vector<2x128xf32>
    %211 = vector.extract_strided_slice %210 {offsets = [0, 0], sizes = [2, 32], strides = [1, 1]} : vector<2x128xf32> to vector<2x32xf32>
    %212 = arith.negf %211 : vector<2x32xf32>
    %213 = math.exp %212 : vector<2x32xf32>
    %cst_70 = arith.constant 1.000000e+00 : f32
    %214 = vector.broadcast %cst_70 : f32 to vector<2x32xf32>
    %215 = arith.addf %214, %213 : vector<2x32xf32>
    %216 = arith.divf %214, %215 : vector<2x32xf32>
    %217 = vector.extract_strided_slice %210 {offsets = [0, 32], sizes = [2, 32], strides = [1, 1]} : vector<2x128xf32> to vector<2x32xf32>
    %218 = arith.negf %217 : vector<2x32xf32>
    %219 = math.exp %218 : vector<2x32xf32>
    %cst_71 = arith.constant 1.000000e+00 : f32
    %220 = vector.broadcast %cst_71 : f32 to vector<2x32xf32>
    %221 = arith.addf %220, %219 : vector<2x32xf32>
    %222 = arith.divf %220, %221 : vector<2x32xf32>
    %223 = vector.extract_strided_slice %206 {offsets = [0, 64], sizes = [2, 32], strides = [1, 1]} : vector<2x128xf32> to vector<2x32xf32>
    %224 = vector.extract_strided_slice %209 {offsets = [0, 64], sizes = [2, 32], strides = [1, 1]} : vector<2x128xf32> to vector<2x32xf32>
    %225 = arith.addf %224, %10 : vector<2x32xf32>
    %226 = arith.mulf %216, %225 : vector<2x32xf32>
    %227 = arith.addf %223, %226 : vector<2x32xf32>
    %228 = math.tanh %227 : vector<2x32xf32>
    %229 = arith.subf %199, %228 : vector<2x32xf32>
    %230 = arith.mulf %222, %229 : vector<2x32xf32>
    %231 = arith.addf %228, %230 : vector<2x32xf32>
    %232 = arith.index_cast %c6_i32 : i32 to index
    %c0_72 = arith.constant 0 : index
    %c0_73 = arith.constant 0 : index
    %233 = vector.load %arg13[%232, %c0_72, %c0_73] : memref<8x2x32xf32, #tpu.memory_space<vmem>>, vector<1x2x32xf32>
    %234 = vector.shape_cast %233 : vector<1x2x32xf32> to vector<2x32xf32>
    %235 = vector.shape_cast %231 : vector<2x32xf32> to vector<1x2x32xf32>
    tpu.vector_store %arg13[%232, %c0_72, %c0_73], %235 {strides = array<i32>} : memref<8x2x32xf32, #tpu.memory_space<vmem>>, vector<1x2x32xf32>,
    %c7_i32 = arith.constant 7 : i32
    %236 = arith.index_cast %c7_i32 : i32 to index
    %c0_74 = arith.constant 0 : index
    %c0_75 = arith.constant 0 : index
    %237 = vector.load %arg12[%236, %c0_74, %c0_75] : memref<8x2x128xf32, #tpu.memory_space<vmem>>, vector<1x2x128xf32>
    %238 = vector.shape_cast %237 : vector<1x2x128xf32> to vector<2x128xf32>
    %239 = arith.truncf %231 : vector<2x32xf32> to vector<2x32xbf16>
    %c0_76 = arith.constant 0 : index
    %c0_77 = arith.constant 0 : index
    %240 = vector.load %arg2[%c0_76, %c0_77] : memref<32x128xbf16, #tpu.memory_space<vmem>>, vector<32x128xbf16>
    %cst_78 = arith.constant dense<0.000000e+00> : vector<2x128xf32>
    %241 = tpu.matmul %239, %240, %cst_78 {dimension_numbers = #tpu.dot_dimension_numbers<[1], [0], [0], [1], [0, 0, 1, 1], [], []>} : vector<2x32xbf16>, vector<32x128xbf16>, vector<2x128xf32> -> vector<2x128xf32>
    %242 = arith.addf %238, %241 : vector<2x128xf32>
    %243 = vector.extract_strided_slice %242 {offsets = [0, 0], sizes = [2, 32], strides = [1, 1]} : vector<2x128xf32> to vector<2x32xf32>
    %244 = arith.negf %243 : vector<2x32xf32>
    %245 = math.exp %244 : vector<2x32xf32>
    %cst_79 = arith.constant 1.000000e+00 : f32
    %246 = vector.broadcast %cst_79 : f32 to vector<2x32xf32>
    %247 = arith.addf %246, %245 : vector<2x32xf32>
    %248 = arith.divf %246, %247 : vector<2x32xf32>
    %249 = vector.extract_strided_slice %242 {offsets = [0, 32], sizes = [2, 32], strides = [1, 1]} : vector<2x128xf32> to vector<2x32xf32>
    %250 = arith.negf %249 : vector<2x32xf32>
    %251 = math.exp %250 : vector<2x32xf32>
    %cst_80 = arith.constant 1.000000e+00 : f32
    %252 = vector.broadcast %cst_80 : f32 to vector<2x32xf32>
    %253 = arith.addf %252, %251 : vector<2x32xf32>
    %254 = arith.divf %252, %253 : vector<2x32xf32>
    %255 = vector.extract_strided_slice %238 {offsets = [0, 64], sizes = [2, 32], strides = [1, 1]} : vector<2x128xf32> to vector<2x32xf32>
    %256 = vector.extract_strided_slice %241 {offsets = [0, 64], sizes = [2, 32], strides = [1, 1]} : vector<2x128xf32> to vector<2x32xf32>
    %257 = arith.addf %256, %10 : vector<2x32xf32>
    %258 = arith.mulf %248, %257 : vector<2x32xf32>
    %259 = arith.addf %255, %258 : vector<2x32xf32>
    %260 = math.tanh %259 : vector<2x32xf32>
    %261 = arith.subf %231, %260 : vector<2x32xf32>
    %262 = arith.mulf %254, %261 : vector<2x32xf32>
    %263 = arith.addf %260, %262 : vector<2x32xf32>
    %264 = arith.index_cast %c7_i32 : i32 to index
    %c0_81 = arith.constant 0 : index
    %c0_82 = arith.constant 0 : index
    %265 = vector.load %arg13[%264, %c0_81, %c0_82] : memref<8x2x32xf32, #tpu.memory_space<vmem>>, vector<1x2x32xf32>
    %266 = vector.shape_cast %265 : vector<1x2x32xf32> to vector<2x32xf32>
    %267 = vector.shape_cast %263 : vector<2x32xf32> to vector<1x2x32xf32>
    tpu.vector_store %arg13[%264, %c0_81, %c0_82], %267 {strides = array<i32>} : memref<8x2x32xf32, #tpu.memory_space<vmem>>, vector<1x2x32xf32>,
    %c8_i32 = arith.constant 8 : i32
    %c0_83 = arith.constant 0 : index
    %c0_84 = arith.constant 0 : index
    %c0_85 = arith.constant 0 : index
    %268 = vector.load %arg13[%c0_83, %c0_84, %c0_85] : memref<8x2x32xf32, #tpu.memory_space<vmem>>, vector<8x2x32xf32>
    %269 = vector.shape_cast %268 : vector<8x2x32xf32> to vector<16x32xf32>
    %270 = arith.truncf %269 : vector<16x32xf32> to vector<16x32xbf16>
    %c0_86 = arith.constant 0 : index
    %c0_87 = arith.constant 0 : index
    %271 = vector.load %arg5[%c0_86, %c0_87] : memref<32x128xbf16, #tpu.memory_space<vmem>>, vector<32x128xbf16>
    %cst_88 = arith.constant dense<0.000000e+00> : vector<16x128xf32>
    %272 = tpu.matmul %270, %271, %cst_88 {dimension_numbers = #tpu.dot_dimension_numbers<[1], [0], [0], [1], [0, 0, 1, 1], [], []>} : vector<16x32xbf16>, vector<32x128xbf16>, vector<16x128xf32> -> vector<16x128xf32>
    %c0_89 = arith.constant 0 : index
    %c0_90 = arith.constant 0 : index
    %273 = vector.load %arg7[%c0_89, %c0_90] : memref<1x128xf32, #tpu.memory_space<vmem>>, vector<1x128xf32>
    %274 = vector.broadcast %273 : vector<1x128xf32> to vector<16x128xf32>
    %275 = arith.addf %272, %274 : vector<16x128xf32>
    %276 = vector.shape_cast %275 : vector<16x128xf32> to vector<8x2x128xf32>
    %c0_91 = arith.constant 0 : index
    %c0_92 = arith.constant 0 : index
    %c0_93 = arith.constant 0 : index
    %277 = vector.load %arg12[%c0_91, %c0_92, %c0_93] : memref<8x2x128xf32, #tpu.memory_space<vmem>>, vector<8x2x128xf32>
    tpu.vector_store %arg12[%c0_91, %c0_92, %c0_93], %276 {strides = array<i32>} : memref<8x2x128xf32, #tpu.memory_space<vmem>>, vector<8x2x128xf32>,
    %c0_94 = arith.constant 0 : index
    %c0_95 = arith.constant 0 : index
    %278 = vector.load %arg8[%c0_94, %c0_95] : memref<1x32xf32, #tpu.memory_space<vmem>>, vector<1x32xf32>
    %279 = vector.shape_cast %278 : vector<1x32xf32> to vector<1x32xf32>
    %280 = vector.broadcast %279 : vector<1x32xf32> to vector<2x32xf32>
    %cst_96 = arith.constant 0.000000e+00 : f32
    %281 = vector.broadcast %cst_96 : f32 to vector<2x32xf32>
    %c0_i32_97 = arith.constant 0 : i32
    %282 = arith.index_cast %c0_i32_97 : i32 to index
    %c0_98 = arith.constant 0 : index
    %c0_99 = arith.constant 0 : index
    %283 = vector.load %arg12[%282, %c0_98, %c0_99] : memref<8x2x128xf32, #tpu.memory_space<vmem>>, vector<1x2x128xf32>
    %284 = vector.shape_cast %283 : vector<1x2x128xf32> to vector<2x128xf32>
    %285 = arith.truncf %281 : vector<2x32xf32> to vector<2x32xbf16>
    %c0_100 = arith.constant 0 : index
    %c0_101 = arith.constant 0 : index
    %286 = vector.load %arg6[%c0_100, %c0_101] : memref<32x128xbf16, #tpu.memory_space<vmem>>, vector<32x128xbf16>
    %cst_102 = arith.constant dense<0.000000e+00> : vector<2x128xf32>
    %287 = tpu.matmul %285, %286, %cst_102 {dimension_numbers = #tpu.dot_dimension_numbers<[1], [0], [0], [1], [0, 0, 1, 1], [], []>} : vector<2x32xbf16>, vector<32x128xbf16>, vector<2x128xf32> -> vector<2x128xf32>
    %288 = arith.addf %284, %287 : vector<2x128xf32>
    %289 = vector.extract_strided_slice %288 {offsets = [0, 0], sizes = [2, 32], strides = [1, 1]} : vector<2x128xf32> to vector<2x32xf32>
    %290 = arith.negf %289 : vector<2x32xf32>
    %291 = math.exp %290 : vector<2x32xf32>
    %cst_103 = arith.constant 1.000000e+00 : f32
    %292 = vector.broadcast %cst_103 : f32 to vector<2x32xf32>
    %293 = arith.addf %292, %291 : vector<2x32xf32>
    %294 = arith.divf %292, %293 : vector<2x32xf32>
    %295 = vector.extract_strided_slice %288 {offsets = [0, 32], sizes = [2, 32], strides = [1, 1]} : vector<2x128xf32> to vector<2x32xf32>
    %296 = arith.negf %295 : vector<2x32xf32>
    %297 = math.exp %296 : vector<2x32xf32>
    %cst_104 = arith.constant 1.000000e+00 : f32
    %298 = vector.broadcast %cst_104 : f32 to vector<2x32xf32>
    %299 = arith.addf %298, %297 : vector<2x32xf32>
    %300 = arith.divf %298, %299 : vector<2x32xf32>
    %301 = vector.extract_strided_slice %284 {offsets = [0, 64], sizes = [2, 32], strides = [1, 1]} : vector<2x128xf32> to vector<2x32xf32>
    %302 = vector.extract_strided_slice %287 {offsets = [0, 64], sizes = [2, 32], strides = [1, 1]} : vector<2x128xf32> to vector<2x32xf32>
    %303 = arith.addf %302, %280 : vector<2x32xf32>
    %304 = arith.mulf %294, %303 : vector<2x32xf32>
    %305 = arith.addf %301, %304 : vector<2x32xf32>
    %306 = math.tanh %305 : vector<2x32xf32>
    %307 = arith.subf %281, %306 : vector<2x32xf32>
    %308 = arith.mulf %300, %307 : vector<2x32xf32>
    %309 = arith.addf %306, %308 : vector<2x32xf32>
    %c1_i32_105 = arith.constant 1 : i32
    %310 = arith.index_cast %c1_i32_105 : i32 to index
    %c0_106 = arith.constant 0 : index
    %c0_107 = arith.constant 0 : index
    %311 = vector.load %arg12[%310, %c0_106, %c0_107] : memref<8x2x128xf32, #tpu.memory_space<vmem>>, vector<1x2x128xf32>
    %312 = vector.shape_cast %311 : vector<1x2x128xf32> to vector<2x128xf32>
    %313 = arith.truncf %309 : vector<2x32xf32> to vector<2x32xbf16>
    %c0_108 = arith.constant 0 : index
    %c0_109 = arith.constant 0 : index
    %314 = vector.load %arg6[%c0_108, %c0_109] : memref<32x128xbf16, #tpu.memory_space<vmem>>, vector<32x128xbf16>
    %cst_110 = arith.constant dense<0.000000e+00> : vector<2x128xf32>
    %315 = tpu.matmul %313, %314, %cst_110 {dimension_numbers = #tpu.dot_dimension_numbers<[1], [0], [0], [1], [0, 0, 1, 1], [], []>} : vector<2x32xbf16>, vector<32x128xbf16>, vector<2x128xf32> -> vector<2x128xf32>
    %316 = arith.addf %312, %315 : vector<2x128xf32>
    %317 = vector.extract_strided_slice %316 {offsets = [0, 0], sizes = [2, 32], strides = [1, 1]} : vector<2x128xf32> to vector<2x32xf32>
    %318 = arith.negf %317 : vector<2x32xf32>
    %319 = math.exp %318 : vector<2x32xf32>
    %cst_111 = arith.constant 1.000000e+00 : f32
    %320 = vector.broadcast %cst_111 : f32 to vector<2x32xf32>
    %321 = arith.addf %320, %319 : vector<2x32xf32>
    %322 = arith.divf %320, %321 : vector<2x32xf32>
    %323 = vector.extract_strided_slice %316 {offsets = [0, 32], sizes = [2, 32], strides = [1, 1]} : vector<2x128xf32> to vector<2x32xf32>
    %324 = arith.negf %323 : vector<2x32xf32>
    %325 = math.exp %324 : vector<2x32xf32>
    %cst_112 = arith.constant 1.000000e+00 : f32
    %326 = vector.broadcast %cst_112 : f32 to vector<2x32xf32>
    %327 = arith.addf %326, %325 : vector<2x32xf32>
    %328 = arith.divf %326, %327 : vector<2x32xf32>
    %329 = vector.extract_strided_slice %312 {offsets = [0, 64], sizes = [2, 32], strides = [1, 1]} : vector<2x128xf32> to vector<2x32xf32>
    %330 = vector.extract_strided_slice %315 {offsets = [0, 64], sizes = [2, 32], strides = [1, 1]} : vector<2x128xf32> to vector<2x32xf32>
    %331 = arith.addf %330, %280 : vector<2x32xf32>
    %332 = arith.mulf %322, %331 : vector<2x32xf32>
    %333 = arith.addf %329, %332 : vector<2x32xf32>
    %334 = math.tanh %333 : vector<2x32xf32>
    %335 = arith.subf %309, %334 : vector<2x32xf32>
    %336 = arith.mulf %328, %335 : vector<2x32xf32>
    %337 = arith.addf %334, %336 : vector<2x32xf32>
    %c2_i32_113 = arith.constant 2 : i32
    %338 = arith.index_cast %c2_i32_113 : i32 to index
    %c0_114 = arith.constant 0 : index
    %c0_115 = arith.constant 0 : index
    %339 = vector.load %arg12[%338, %c0_114, %c0_115] : memref<8x2x128xf32, #tpu.memory_space<vmem>>, vector<1x2x128xf32>
    %340 = vector.shape_cast %339 : vector<1x2x128xf32> to vector<2x128xf32>
    %341 = arith.truncf %337 : vector<2x32xf32> to vector<2x32xbf16>
    %c0_116 = arith.constant 0 : index
    %c0_117 = arith.constant 0 : index
    %342 = vector.load %arg6[%c0_116, %c0_117] : memref<32x128xbf16, #tpu.memory_space<vmem>>, vector<32x128xbf16>
    %cst_118 = arith.constant dense<0.000000e+00> : vector<2x128xf32>
    %343 = tpu.matmul %341, %342, %cst_118 {dimension_numbers = #tpu.dot_dimension_numbers<[1], [0], [0], [1], [0, 0, 1, 1], [], []>} : vector<2x32xbf16>, vector<32x128xbf16>, vector<2x128xf32> -> vector<2x128xf32>
    %344 = arith.addf %340, %343 : vector<2x128xf32>
    %345 = vector.extract_strided_slice %344 {offsets = [0, 0], sizes = [2, 32], strides = [1, 1]} : vector<2x128xf32> to vector<2x32xf32>
    %346 = arith.negf %345 : vector<2x32xf32>
    %347 = math.exp %346 : vector<2x32xf32>
    %cst_119 = arith.constant 1.000000e+00 : f32
    %348 = vector.broadcast %cst_119 : f32 to vector<2x32xf32>
    %349 = arith.addf %348, %347 : vector<2x32xf32>
    %350 = arith.divf %348, %349 : vector<2x32xf32>
    %351 = vector.extract_strided_slice %344 {offsets = [0, 32], sizes = [2, 32], strides = [1, 1]} : vector<2x128xf32> to vector<2x32xf32>
    %352 = arith.negf %351 : vector<2x32xf32>
    %353 = math.exp %352 : vector<2x32xf32>
    %cst_120 = arith.constant 1.000000e+00 : f32
    %354 = vector.broadcast %cst_120 : f32 to vector<2x32xf32>
    %355 = arith.addf %354, %353 : vector<2x32xf32>
    %356 = arith.divf %354, %355 : vector<2x32xf32>
    %357 = vector.extract_strided_slice %340 {offsets = [0, 64], sizes = [2, 32], strides = [1, 1]} : vector<2x128xf32> to vector<2x32xf32>
    %358 = vector.extract_strided_slice %343 {offsets = [0, 64], sizes = [2, 32], strides = [1, 1]} : vector<2x128xf32> to vector<2x32xf32>
    %359 = arith.addf %358, %280 : vector<2x32xf32>
    %360 = arith.mulf %350, %359 : vector<2x32xf32>
    %361 = arith.addf %357, %360 : vector<2x32xf32>
    %362 = math.tanh %361 : vector<2x32xf32>
    %363 = arith.subf %337, %362 : vector<2x32xf32>
    %364 = arith.mulf %356, %363 : vector<2x32xf32>
    %365 = arith.addf %362, %364 : vector<2x32xf32>
    %c3_i32_121 = arith.constant 3 : i32
    %366 = arith.index_cast %c3_i32_121 : i32 to index
    %c0_122 = arith.constant 0 : index
    %c0_123 = arith.constant 0 : index
    %367 = vector.load %arg12[%366, %c0_122, %c0_123] : memref<8x2x128xf32, #tpu.memory_space<vmem>>, vector<1x2x128xf32>
    %368 = vector.shape_cast %367 : vector<1x2x128xf32> to vector<2x128xf32>
    %369 = arith.truncf %365 : vector<2x32xf32> to vector<2x32xbf16>
    %c0_124 = arith.constant 0 : index
    %c0_125 = arith.constant 0 : index
    %370 = vector.load %arg6[%c0_124, %c0_125] : memref<32x128xbf16, #tpu.memory_space<vmem>>, vector<32x128xbf16>
    %cst_126 = arith.constant dense<0.000000e+00> : vector<2x128xf32>
    %371 = tpu.matmul %369, %370, %cst_126 {dimension_numbers = #tpu.dot_dimension_numbers<[1], [0], [0], [1], [0, 0, 1, 1], [], []>} : vector<2x32xbf16>, vector<32x128xbf16>, vector<2x128xf32> -> vector<2x128xf32>
    %372 = arith.addf %368, %371 : vector<2x128xf32>
    %373 = vector.extract_strided_slice %372 {offsets = [0, 0], sizes = [2, 32], strides = [1, 1]} : vector<2x128xf32> to vector<2x32xf32>
    %374 = arith.negf %373 : vector<2x32xf32>
    %375 = math.exp %374 : vector<2x32xf32>
    %cst_127 = arith.constant 1.000000e+00 : f32
    %376 = vector.broadcast %cst_127 : f32 to vector<2x32xf32>
    %377 = arith.addf %376, %375 : vector<2x32xf32>
    %378 = arith.divf %376, %377 : vector<2x32xf32>
    %379 = vector.extract_strided_slice %372 {offsets = [0, 32], sizes = [2, 32], strides = [1, 1]} : vector<2x128xf32> to vector<2x32xf32>
    %380 = arith.negf %379 : vector<2x32xf32>
    %381 = math.exp %380 : vector<2x32xf32>
    %cst_128 = arith.constant 1.000000e+00 : f32
    %382 = vector.broadcast %cst_128 : f32 to vector<2x32xf32>
    %383 = arith.addf %382, %381 : vector<2x32xf32>
    %384 = arith.divf %382, %383 : vector<2x32xf32>
    %385 = vector.extract_strided_slice %368 {offsets = [0, 64], sizes = [2, 32], strides = [1, 1]} : vector<2x128xf32> to vector<2x32xf32>
    %386 = vector.extract_strided_slice %371 {offsets = [0, 64], sizes = [2, 32], strides = [1, 1]} : vector<2x128xf32> to vector<2x32xf32>
    %387 = arith.addf %386, %280 : vector<2x32xf32>
    %388 = arith.mulf %378, %387 : vector<2x32xf32>
    %389 = arith.addf %385, %388 : vector<2x32xf32>
    %390 = math.tanh %389 : vector<2x32xf32>
    %391 = arith.subf %365, %390 : vector<2x32xf32>
    %392 = arith.mulf %384, %391 : vector<2x32xf32>
    %393 = arith.addf %390, %392 : vector<2x32xf32>
    %c4_i32_129 = arith.constant 4 : i32
    %394 = arith.index_cast %c4_i32_129 : i32 to index
    %c0_130 = arith.constant 0 : index
    %c0_131 = arith.constant 0 : index
    %395 = vector.load %arg12[%394, %c0_130, %c0_131] : memref<8x2x128xf32, #tpu.memory_space<vmem>>, vector<1x2x128xf32>
    %396 = vector.shape_cast %395 : vector<1x2x128xf32> to vector<2x128xf32>
    %397 = arith.truncf %393 : vector<2x32xf32> to vector<2x32xbf16>
    %c0_132 = arith.constant 0 : index
    %c0_133 = arith.constant 0 : index
    %398 = vector.load %arg6[%c0_132, %c0_133] : memref<32x128xbf16, #tpu.memory_space<vmem>>, vector<32x128xbf16>
    %cst_134 = arith.constant dense<0.000000e+00> : vector<2x128xf32>
    %399 = tpu.matmul %397, %398, %cst_134 {dimension_numbers = #tpu.dot_dimension_numbers<[1], [0], [0], [1], [0, 0, 1, 1], [], []>} : vector<2x32xbf16>, vector<32x128xbf16>, vector<2x128xf32> -> vector<2x128xf32>
    %400 = arith.addf %396, %399 : vector<2x128xf32>
    %401 = vector.extract_strided_slice %400 {offsets = [0, 0], sizes = [2, 32], strides = [1, 1]} : vector<2x128xf32> to vector<2x32xf32>
    %402 = arith.negf %401 : vector<2x32xf32>
    %403 = math.exp %402 : vector<2x32xf32>
    %cst_135 = arith.constant 1.000000e+00 : f32
    %404 = vector.broadcast %cst_135 : f32 to vector<2x32xf32>
    %405 = arith.addf %404, %403 : vector<2x32xf32>
    %406 = arith.divf %404, %405 : vector<2x32xf32>
    %407 = vector.extract_strided_slice %400 {offsets = [0, 32], sizes = [2, 32], strides = [1, 1]} : vector<2x128xf32> to vector<2x32xf32>
    %408 = arith.negf %407 : vector<2x32xf32>
    %409 = math.exp %408 : vector<2x32xf32>
    %cst_136 = arith.constant 1.000000e+00 : f32
    %410 = vector.broadcast %cst_136 : f32 to vector<2x32xf32>
    %411 = arith.addf %410, %409 : vector<2x32xf32>
    %412 = arith.divf %410, %411 : vector<2x32xf32>
    %413 = vector.extract_strided_slice %396 {offsets = [0, 64], sizes = [2, 32], strides = [1, 1]} : vector<2x128xf32> to vector<2x32xf32>
    %414 = vector.extract_strided_slice %399 {offsets = [0, 64], sizes = [2, 32], strides = [1, 1]} : vector<2x128xf32> to vector<2x32xf32>
    %415 = arith.addf %414, %280 : vector<2x32xf32>
    %416 = arith.mulf %406, %415 : vector<2x32xf32>
    %417 = arith.addf %413, %416 : vector<2x32xf32>
    %418 = math.tanh %417 : vector<2x32xf32>
    %419 = arith.subf %393, %418 : vector<2x32xf32>
    %420 = arith.mulf %412, %419 : vector<2x32xf32>
    %421 = arith.addf %418, %420 : vector<2x32xf32>
    %c5_i32_137 = arith.constant 5 : i32
    %422 = arith.index_cast %c5_i32_137 : i32 to index
    %c0_138 = arith.constant 0 : index
    %c0_139 = arith.constant 0 : index
    %423 = vector.load %arg12[%422, %c0_138, %c0_139] : memref<8x2x128xf32, #tpu.memory_space<vmem>>, vector<1x2x128xf32>
    %424 = vector.shape_cast %423 : vector<1x2x128xf32> to vector<2x128xf32>
    %425 = arith.truncf %421 : vector<2x32xf32> to vector<2x32xbf16>
    %c0_140 = arith.constant 0 : index
    %c0_141 = arith.constant 0 : index
    %426 = vector.load %arg6[%c0_140, %c0_141] : memref<32x128xbf16, #tpu.memory_space<vmem>>, vector<32x128xbf16>
    %cst_142 = arith.constant dense<0.000000e+00> : vector<2x128xf32>
    %427 = tpu.matmul %425, %426, %cst_142 {dimension_numbers = #tpu.dot_dimension_numbers<[1], [0], [0], [1], [0, 0, 1, 1], [], []>} : vector<2x32xbf16>, vector<32x128xbf16>, vector<2x128xf32> -> vector<2x128xf32>
    %428 = arith.addf %424, %427 : vector<2x128xf32>
    %429 = vector.extract_strided_slice %428 {offsets = [0, 0], sizes = [2, 32], strides = [1, 1]} : vector<2x128xf32> to vector<2x32xf32>
    %430 = arith.negf %429 : vector<2x32xf32>
    %431 = math.exp %430 : vector<2x32xf32>
    %cst_143 = arith.constant 1.000000e+00 : f32
    %432 = vector.broadcast %cst_143 : f32 to vector<2x32xf32>
    %433 = arith.addf %432, %431 : vector<2x32xf32>
    %434 = arith.divf %432, %433 : vector<2x32xf32>
    %435 = vector.extract_strided_slice %428 {offsets = [0, 32], sizes = [2, 32], strides = [1, 1]} : vector<2x128xf32> to vector<2x32xf32>
    %436 = arith.negf %435 : vector<2x32xf32>
    %437 = math.exp %436 : vector<2x32xf32>
    %cst_144 = arith.constant 1.000000e+00 : f32
    %438 = vector.broadcast %cst_144 : f32 to vector<2x32xf32>
    %439 = arith.addf %438, %437 : vector<2x32xf32>
    %440 = arith.divf %438, %439 : vector<2x32xf32>
    %441 = vector.extract_strided_slice %424 {offsets = [0, 64], sizes = [2, 32], strides = [1, 1]} : vector<2x128xf32> to vector<2x32xf32>
    %442 = vector.extract_strided_slice %427 {offsets = [0, 64], sizes = [2, 32], strides = [1, 1]} : vector<2x128xf32> to vector<2x32xf32>
    %443 = arith.addf %442, %280 : vector<2x32xf32>
    %444 = arith.mulf %434, %443 : vector<2x32xf32>
    %445 = arith.addf %441, %444 : vector<2x32xf32>
    %446 = math.tanh %445 : vector<2x32xf32>
    %447 = arith.subf %421, %446 : vector<2x32xf32>
    %448 = arith.mulf %440, %447 : vector<2x32xf32>
    %449 = arith.addf %446, %448 : vector<2x32xf32>
    %c6_i32_145 = arith.constant 6 : i32
    %450 = arith.index_cast %c6_i32_145 : i32 to index
    %c0_146 = arith.constant 0 : index
    %c0_147 = arith.constant 0 : index
    %451 = vector.load %arg12[%450, %c0_146, %c0_147] : memref<8x2x128xf32, #tpu.memory_space<vmem>>, vector<1x2x128xf32>
    %452 = vector.shape_cast %451 : vector<1x2x128xf32> to vector<2x128xf32>
    %453 = arith.truncf %449 : vector<2x32xf32> to vector<2x32xbf16>
    %c0_148 = arith.constant 0 : index
    %c0_149 = arith.constant 0 : index
    %454 = vector.load %arg6[%c0_148, %c0_149] : memref<32x128xbf16, #tpu.memory_space<vmem>>, vector<32x128xbf16>
    %cst_150 = arith.constant dense<0.000000e+00> : vector<2x128xf32>
    %455 = tpu.matmul %453, %454, %cst_150 {dimension_numbers = #tpu.dot_dimension_numbers<[1], [0], [0], [1], [0, 0, 1, 1], [], []>} : vector<2x32xbf16>, vector<32x128xbf16>, vector<2x128xf32> -> vector<2x128xf32>
    %456 = arith.addf %452, %455 : vector<2x128xf32>
    %457 = vector.extract_strided_slice %456 {offsets = [0, 0], sizes = [2, 32], strides = [1, 1]} : vector<2x128xf32> to vector<2x32xf32>
    %458 = arith.negf %457 : vector<2x32xf32>
    %459 = math.exp %458 : vector<2x32xf32>
    %cst_151 = arith.constant 1.000000e+00 : f32
    %460 = vector.broadcast %cst_151 : f32 to vector<2x32xf32>
    %461 = arith.addf %460, %459 : vector<2x32xf32>
    %462 = arith.divf %460, %461 : vector<2x32xf32>
    %463 = vector.extract_strided_slice %456 {offsets = [0, 32], sizes = [2, 32], strides = [1, 1]} : vector<2x128xf32> to vector<2x32xf32>
    %464 = arith.negf %463 : vector<2x32xf32>
    %465 = math.exp %464 : vector<2x32xf32>
    %cst_152 = arith.constant 1.000000e+00 : f32
    %466 = vector.broadcast %cst_152 : f32 to vector<2x32xf32>
    %467 = arith.addf %466, %465 : vector<2x32xf32>
    %468 = arith.divf %466, %467 : vector<2x32xf32>
    %469 = vector.extract_strided_slice %452 {offsets = [0, 64], sizes = [2, 32], strides = [1, 1]} : vector<2x128xf32> to vector<2x32xf32>
    %470 = vector.extract_strided_slice %455 {offsets = [0, 64], sizes = [2, 32], strides = [1, 1]} : vector<2x128xf32> to vector<2x32xf32>
    %471 = arith.addf %470, %280 : vector<2x32xf32>
    %472 = arith.mulf %462, %471 : vector<2x32xf32>
    %473 = arith.addf %469, %472 : vector<2x32xf32>
    %474 = math.tanh %473 : vector<2x32xf32>
    %475 = arith.subf %449, %474 : vector<2x32xf32>
    %476 = arith.mulf %468, %475 : vector<2x32xf32>
    %477 = arith.addf %474, %476 : vector<2x32xf32>
    %c7_i32_153 = arith.constant 7 : i32
    %478 = arith.index_cast %c7_i32_153 : i32 to index
    %c0_154 = arith.constant 0 : index
    %c0_155 = arith.constant 0 : index
    %479 = vector.load %arg12[%478, %c0_154, %c0_155] : memref<8x2x128xf32, #tpu.memory_space<vmem>>, vector<1x2x128xf32>
    %480 = vector.shape_cast %479 : vector<1x2x128xf32> to vector<2x128xf32>
    %481 = arith.truncf %477 : vector<2x32xf32> to vector<2x32xbf16>
    %c0_156 = arith.constant 0 : index
    %c0_157 = arith.constant 0 : index
    %482 = vector.load %arg6[%c0_156, %c0_157] : memref<32x128xbf16, #tpu.memory_space<vmem>>, vector<32x128xbf16>
    %cst_158 = arith.constant dense<0.000000e+00> : vector<2x128xf32>
    %483 = tpu.matmul %481, %482, %cst_158 {dimension_numbers = #tpu.dot_dimension_numbers<[1], [0], [0], [1], [0, 0, 1, 1], [], []>} : vector<2x32xbf16>, vector<32x128xbf16>, vector<2x128xf32> -> vector<2x128xf32>
    %484 = arith.addf %480, %483 : vector<2x128xf32>
    %485 = vector.extract_strided_slice %484 {offsets = [0, 0], sizes = [2, 32], strides = [1, 1]} : vector<2x128xf32> to vector<2x32xf32>
    %486 = arith.negf %485 : vector<2x32xf32>
    %487 = math.exp %486 : vector<2x32xf32>
    %cst_159 = arith.constant 1.000000e+00 : f32
    %488 = vector.broadcast %cst_159 : f32 to vector<2x32xf32>
    %489 = arith.addf %488, %487 : vector<2x32xf32>
    %490 = arith.divf %488, %489 : vector<2x32xf32>
    %491 = vector.extract_strided_slice %484 {offsets = [0, 32], sizes = [2, 32], strides = [1, 1]} : vector<2x128xf32> to vector<2x32xf32>
    %492 = arith.negf %491 : vector<2x32xf32>
    %493 = math.exp %492 : vector<2x32xf32>
    %cst_160 = arith.constant 1.000000e+00 : f32
    %494 = vector.broadcast %cst_160 : f32 to vector<2x32xf32>
    %495 = arith.addf %494, %493 : vector<2x32xf32>
    %496 = arith.divf %494, %495 : vector<2x32xf32>
    %497 = vector.extract_strided_slice %480 {offsets = [0, 64], sizes = [2, 32], strides = [1, 1]} : vector<2x128xf32> to vector<2x32xf32>
    %498 = vector.extract_strided_slice %483 {offsets = [0, 64], sizes = [2, 32], strides = [1, 1]} : vector<2x128xf32> to vector<2x32xf32>
    %499 = arith.addf %498, %280 : vector<2x32xf32>
    %500 = arith.mulf %490, %499 : vector<2x32xf32>
    %501 = arith.addf %497, %500 : vector<2x32xf32>
    %502 = math.tanh %501 : vector<2x32xf32>
    %503 = arith.subf %477, %502 : vector<2x32xf32>
    %504 = arith.mulf %496, %503 : vector<2x32xf32>
    %505 = arith.addf %502, %504 : vector<2x32xf32>
    %c8_i32_161 = arith.constant 8 : i32
    %506 = arith.truncf %505 : vector<2x32xf32> to vector<2x32xbf16>
    %c0_162 = arith.constant 0 : index
    %c0_163 = arith.constant 0 : index
    %507 = vector.load %arg9[%c0_162, %c0_163] : memref<32x128xbf16, #tpu.memory_space<vmem>>, vector<32x128xbf16>
    %cst_164 = arith.constant dense<0.000000e+00> : vector<2x128xf32>
    %508 = tpu.matmul %506, %507, %cst_164 {dimension_numbers = #tpu.dot_dimension_numbers<[1], [0], [0], [1], [0, 0, 1, 1], [], []>} : vector<2x32xbf16>, vector<32x128xbf16>, vector<2x128xf32> -> vector<2x128xf32>
    %c0_165 = arith.constant 0 : index
    %c0_166 = arith.constant 0 : index
    %509 = vector.load %arg10[%c0_165, %c0_166] : memref<1x128xf32, #tpu.memory_space<vmem>>, vector<1x128xf32>
    %510 = vector.broadcast %509 : vector<1x128xf32> to vector<2x128xf32>
    %511 = arith.addf %508, %510 : vector<2x128xf32>
    %c0_167 = arith.constant 0 : index
    %c0_168 = arith.constant 0 : index
    %512 = vector.load %arg11[%c0_167, %c0_168] : memref<2x128xf32, #tpu.memory_space<vmem>>, vector<2x128xf32>
    tpu.vector_store %arg11[%c0_167, %c0_168], %511 {strides = array<i32>} : memref<2x128xf32, #tpu.memory_space<vmem>>, vector<2x128xf32>,
    return
  }
}

</mosaic_0001>

<bundles_post_ra>
// kernel: gru_model_forward.1
= control target key start
LH: loop header
LB: loop body
LE: loop exit
PB: predicated region body
PF: predicated region fallthrough
CT: control target
= control target key end

     0   :  { %v2299_v1 = vmov 0.0   ;;  %vm2300_vm0 = vmmov 0   ;;  %vm62_vm1 = vcmask 130048   ;;  %s2301_s26 = smov 64   ;;  %v2302_v6 = vmov 0   ;;  %s2746_s0 = inlined_call_operand.vmem [shape: bf16[16,16], index: 0, kind: input, shape index: {}]   ;;  %s2747_s1 = inlined_call_operand.vmem [shape: bf16[16,128], index: 1, kind: input, shape index: {}]   ;;  %s2748_s2 = inlined_call_operand.vmem [shape: bf16[32,128], index: 2, kind: input, shape index: {}]   ;;  %s2749_s3 = inlined_call_operand.vmem [shape: f32[1,128], index: 3, kind: input, shape index: {}]   ;;  %s2750_s4 = inlined_call_operand.vmem [shape: f32[1,32], index: 4, kind: input, shape index: {}]   ;;  %s2751_s5 = inlined_call_operand.vmem [shape: bf16[32,128], index: 5, kind: input, shape index: {}]   ;;  %s2752_s6 = inlined_call_operand.vmem [shape: bf16[32,128], index: 6, kind: input, shape index: {}]   ;;  %s2753_s7 = inlined_call_operand.vmem [shape: f32[1,128], index: 7, kind: input, shape index: {}]   ;;  %s2754_s8 = inlined_call_operand.vmem [shape: f32[1,32], index: 8, kind: input, shape index: {}]   ;;  %s2755_s9 = inlined_call_operand.vmem [shape: bf16[32,128], index: 9, kind: input, shape index: {}]   ;;  %s2756_s10 = inlined_call_operand.vmem [shape: f32[1,128], index: 10, kind: input, shape index: {}]   ;;  %s2757_s11 = inlined_call_operand.hbm [shape: f32[2,128], index: 11, kind: output, shape index: {}]  }
   0x1   :  { %v2155_v0 = vld [vmem:[%s2747_s1] sm:$0xff]   ;;  %1997 = vmatprep.subr.bf16.mxu0 %v2299_v1  ;;  %2003 = vmatprep.subr.bf16.mxu1 %v2299_v1  ;;  %v2158_v4 = vld [vmem:[%s2748_s2 + $0x8] sm:$0xff]  }
   0x2   :  { %v2156_v2 = vld [vmem:[%s2748_s2] sm:$0xff]   ;;  %1998 = vmatpush3.bf16.msra.mxu0 %v2155_v0  ;;  %1999 = vmatprep.mubr.msk.bf16.mxu0 %vm2300_vm0, %v2299_v1 }
   0x3   :  { %v2157_v3 = vld [vmem:[%s2746_s0] sm:$0xff]   ;;  %2004 = vmatpush3.bf16.msra.mxu1 %v2156_v2  ;;  %2007 = vmatprep.mubr.msk.bf16.mxu1 %vm2300_vm0, %v2299_v1 }
   0x4   :  { %2005 = vmatprep.subr.bf16.mxu1 %v2299_v1  ;;  %v1879_v5 = vld [vmem:[%s2750_s4] ss:$0 sm:$0xff]  ;;  %2011 = vmatprep.subr.bf16.mxu0 %v2299_v1 }
   0x5   :  { %2000 = vmatmul.mubr.msk.bf16.vlgmr.msra.gmra.mrb[0].mxu0 %vm62_vm1, %v2157_v3  ;;  %233 = vrot.lane.b32.xlu0 %v1879_v5, %s2301_s26 }
   0x6   :  { %2015 = vmatprep.mubr.msk.bf16.mxu0 %vm2300_vm0, %v2299_v1 }
   0x7   :  { %2006 = vmatpush3.bf16.msra.mxu1 %v2158_v4 }
   0x8   :  { %2019 = vmatprep.subr.bf16.mxu1 %v2299_v1 }
   0xa   :  { %2008 = vmatmul.mubr.bf16.vlgmr.msra.gmra.mrb[0].mxu1 %v2302_v6 }
   0xb   :  { %2023 = vmatprep.mubr.msk.bf16.mxu1 %vm2300_vm0, %v2299_v1 }
   0xc   :  { %16 = vsyncpa [#allocation5], 0  ;;  %v2303_v7 = vmov 1983009808   ;;  %v113_v9 = vlaneseq  ;;  %v1871_v12 = vld [vmem:[%s2749_s3] ss:$0 sm:$0xff] }
   0xd   :  { %v111_v8 = vunpack.c.l.s4 %v2303_v7  ;;  %s2304_s3 = smov 96   ;;  %v2159_v48 = vld [vmem:[%s2748_s2] sm:$0xff]   ;;  %v2160_v49 = vld [vmem:[%s2748_s2 + $0x8] sm:$0xff]   ;;  %s2305_s12 = smov 32   ;;  %vm182_vm2 = vcmask 261120   ;;  %vm263_vm3 = vcmask 254976  }
   0xe   :  { %v114_v11 = vshrl.u32 %v113_v9, 7  ;;  %2012 = vmatpush3.bf16.msra.mxu0 %v2159_v48 }
   0xf   :  { %v112_v10 = vunpack.c.0.s8 %v111_v8  ;;  %2013 = vmatprep.subr.bf16.mxu0 %v2299_v1 }
  0x11   :  { %v2400_v13 = vsub.s32 %v112_v10, %v114_v11  ;;  %v2161_v11 = vld [vmem:[%s2748_s2] sm:$0xff]  }
  0x12   :  { %2014 = vmatpush3.bf16.msra.mxu0 %v2160_v49  ;;  %2020 = vmatpush3.bf16.msra.mxu1 %v2161_v11 }
  0x13   :  { %2027 = vmatprep.subr.bf16.mxu0 %v2299_v1  ;;  %2021 = vmatprep.subr.bf16.mxu1 %v2299_v1 }
  0x77   :  { %v2403_v20 = vpop.permute.xlu0 %233 }
  0xd8   :  { %v100_v14 = vpop.f32.mrb[0].mxu0 }
  0xd9   :  { %v101_v15 = vadd.f32 %v1871_v12, %v100_v14  ;;  %v2001_v16 = vpop.f32.mrb[1].mxu0 }
  0xda   :  { %v103_v17 = vpop.f32.mrb[2].mxu0 }
  0xdb   :  { %v109_v18 = vcombine.high %v101_v15, %v101_v15  ;;  %v116_v19 = vrot.slane %v101_v15, %v2400_v13  ;;  %1875 = vst.sshfl [vmem:[#allocation2] sm:$0x3 pattern:$0x76325410] %v101_v15  ;;  %v104_v21 = vadd.f32 %v1871_v12, %v103_v17  ;;  %v2002_v22 = vpop.f32.mrb[3].mxu0  ;;  %v2162_v12 = vld [vmem:[%s2748_s2 + $0x8] sm:$0xff]  }
  0xdc   :  { %2022 = vmatpush3.bf16.msra.mxu1 %v2162_v12 }
  0xdd   :  { %v123_v23 = vrot.slane %v109_v18, %v2400_v13  ;;  %v124_v24 = vcombine.high %v116_v19, %v116_v19  ;;  %1876 = vst.sshfl [vmem:[#allocation2 + $0x4] sm:$0x3 pattern:$0x76325410] %v109_v18  ;;  %v220_v25 = vpop.f32.mrb[0].mxu1  ;;  %v126_v26 = vcombine.high %v104_v21, %v104_v21  ;;  %v133_v27 = vrot.slane %v104_v21, %v2400_v13 }
  0xde   :  { %1877 = vst.sshfl [vmem:[#allocation2 + $0x8] sm:$0x3 pattern:$0x76325410] %v104_v21  ;;  %v236_v28 = vadd.f32 %v2403_v20, %v220_v25  ;;  %v2009_v29 = vpop.f32.mrb[1].mxu1  ;;  %2035 = vmatprep.subr.bf16.mxu1 %v2299_v1 }
  0xdf   :  { %v125_v30 = vcombine.high %v123_v23, %v123_v23  ;;  %152 = vst [vmem:[#allocation2 + $0x2] sm:$0x3] %v124_v24  ;;  %v223_v31 = vpop.f32.mrb[2].mxu1  ;;  %v140_v32 = vrot.slane %v126_v26, %v2400_v13  ;;  %v141_v33 = vcombine.high %v133_v27, %v133_v27 }
  0xe0   :  { %1878 = vst.sshfl [vmem:[#allocation2 + $0xc] sm:$0x3 pattern:$0x76325410] %v126_v26  ;;  %238 = vrot.lane.b32.xlu0 %v236_v28, %s2301_s26  ;;  %v2010_v34 = vpop.f32.mrb[3].mxu1 }
  0xe1   :  { %154 = vst [vmem:[#allocation2 + $0x6] sm:$0x3] %v125_v30  ;;  %v142_v35 = vcombine.high %v140_v32, %v140_v32  ;;  %156 = vst [vmem:[#allocation2 + $0xa] sm:$0x3] %v141_v33 }
  0xe2   :  { %v165_v36 = vld [vmem:[#allocation2] sm:$0x3] }
  0xe3   :  { %158 = vst [vmem:[#allocation2 + $0xe] sm:$0x3] %v142_v35  ;;  %v226_v37 = vadd.f32 %v220_v25, %v165_v36 }
  0xe4   :  { %v367_v26 = vld [vmem:[#allocation2 + $0x4] sm:$0x3] }
  0xe5   :  { %v1882_v38 = vmul.f32 -1.442695, %v226_v37 }
  0xe6   :  { %v266_v61 = vld [vmem:[#allocation2 + $0x2] sm:$0x3] }
  0xe7   :  { %2179 = vpow2.f32 %v1882_v38  ;;  %v2163_v38 = vld [vmem:[%s2748_s2] sm:$0xff]  }
  0xf1   :  { %v2180_v39 = vpop.eup %2179 }
  0xf2   :  { %v230_v40 = vadd.f32 1.0, %v2180_v39  ;;  %v2164_v39 = vld [vmem:[%s2748_s2 + $0x8] sm:$0xff]  }
  0xf4   :  { %2181 = vrcp.f32 %v230_v40 }
  0xfe   :  { %v2182_v41 = vpop.eup %2181 }
 0x152   :  { %v239_v42 = vpop.permute.xlu0 %238 }
 0x153   :  { %v241_v43 = vmul.f32 %v2182_v41, %v239_v42 }
 0x155   :  { %243 = vrot.lane.b32.xlu1 %v241_v43, %s2301_s26 }
 0x1c7   :  { %v244_v44 = vpop.permute.xlu1 %243 }
 0x1c8   :  { %v246_v45 = vadd.f32 %v244_v44, %v165_v36 }
 0x1ca   :  { %2183 = vtanh.f32 %v246_v45 }
 0x1d4   :  { %v2184_v46 = vpop.eup %2183 }
 0x1d5   :  { %v248_v47 = vsub.f32 0.0, %v2184_v46 }
 0x1d7   :  { %250 = vrot.lane.b32.xlu1 %v248_v47, %s2304_s3 }
 0x249   :  { %v251_v50 = vpop.permute.xlu1 %250 }
 0x24a   :  { %v253_v51 = vmul.f32 %v2182_v41, %v251_v50 }
 0x24c   :  { %255 = vrot.lane.b32.xlu0 %v253_v51, %s2305_s12  ;;  %v468_v51 = vld [vmem:[#allocation2 + $0x6] sm:$0x3] }
 0x2be   :  { %v256_v52 = vpop.permute.xlu0 %255 }
 0x2bf   :  { %v2421_v53 = vadd.f32 %v2184_v46, %v256_v52 }
 0x2c1   :  { %v267_v54 = vpack.c.bf16 %v2421_v53, %v2421_v53 }
 0x2c3   :  { %273 = vrot.lane.b32.xlu1 %v267_v54, %s2301_s26 }
 0x335   :  { %v274_v55 = vpop.permute.xlu1 %273 }
 0x336   :  { %2016 = vmatmul.mubr.msk.bf16.vlgmr.msra.gmra.mrb[4].mxu0 %vm182_vm2, %v274_v55 }
 0x337   :  { %2031 = vmatprep.mubr.msk.bf16.mxu0 %vm2300_vm0, %v2299_v1  ;;  %2028 = vmatpush3.bf16.msra.mxu0 %v2163_v38 }
 0x338   :  { %2029 = vmatprep.subr.bf16.mxu0 %v2299_v1 }
 0x33b   :  { %2030 = vmatpush3.bf16.msra.mxu0 %v2164_v39 }
 0x33c   :  { %2043 = vmatprep.subr.bf16.mxu0 %v2299_v1 }
 0x409   :  { %v324_v56 = vpop.f32.mrb[4].mxu0 }
 0x40a   :  { %v337_v57 = vadd.f32 %v324_v56, %v2403_v20  ;;  %v2017_v58 = vpop.f32.mrb[5].mxu0  ;;  %v330_v62 = vadd.f32 %v324_v56, %v266_v61 }
 0x40b   :  { %v327_v59 = vpop.f32.mrb[6].mxu0 }
 0x40c   :  { %339 = vrot.lane.b32.xlu0 %v337_v57, %s2301_s26  ;;  %v2018_v60 = vpop.f32.mrb[7].mxu0  ;;  %v1886_v63 = vmul.f32 -1.442695, %v330_v62 }
 0x40e   :  { %2185 = vpow2.f32 %v1886_v63 }
 0x418   :  { %v2186_v0 = vpop.eup %2185 }
 0x419   :  { %v334_v2 = vadd.f32 1.0, %v2186_v0  ;;  %v2165_v0 = vld [vmem:[%s2748_s2] sm:$0xff]  }
 0x41b   :  { %2187 = vrcp.f32 %v334_v2  ;;  %v2166_v2 = vld [vmem:[%s2748_s2 + $0x8] sm:$0xff]  }
 0x425   :  { %v2188_v3 = vpop.eup %2187 }
 0x47e   :  { %v340_v4 = vpop.permute.xlu0 %339 }
 0x47f   :  { %v342_v5 = vmul.f32 %v2188_v3, %v340_v4 }
 0x481   :  { %344 = vrot.lane.b32.xlu1 %v342_v5, %s2301_s26 }
 0x4f3   :  { %v345_v7 = vpop.permute.xlu1 %344 }
 0x4f4   :  { %v347_v8 = vadd.f32 %v345_v7, %v266_v61 }
 0x4f6   :  { %2189 = vtanh.f32 %v347_v8 }
 0x500   :  { %v2190_v9 = vpop.eup %2189 }
 0x501   :  { %v349_v10 = vsub.f32 %v2421_v53, %v2190_v9 }
 0x503   :  { %351 = vrot.lane.b32.xlu0 %v349_v10, %s2304_s3 }
 0x575   :  { %v352_v14 = vpop.permute.xlu0 %351 }
 0x576   :  { %v354_v15 = vmul.f32 %v2188_v3, %v352_v14 }
 0x578   :  { %356 = vrot.lane.b32.xlu1 %v354_v15, %s2305_s12 }
 0x5ea   :  { %v357_v16 = vpop.permute.xlu1 %356 }
 0x5eb   :  { %v2443_v17 = vadd.f32 %v2190_v9, %v357_v16  ;;  %v569_v16 = vld [vmem:[#allocation2 + $0x8] sm:$0x3] }
 0x5ed   :  { %v368_v18 = vpack.c.bf16 %v2443_v17, %v2443_v17 }
 0x5ef   :  { %374 = vrot.lane.b32.xlu0 %v368_v18, %s2301_s26 }
 0x661   :  { %v375_v19 = vpop.permute.xlu0 %374 }
 0x662   :  { %2024 = vmatmul.mubr.msk.bf16.vlgmr.msra.gmra.mrb[4].mxu1 %vm182_vm2, %v375_v19 }
 0x663   :  { %2039 = vmatprep.mubr.msk.bf16.mxu1 %vm2300_vm0, %v2299_v1  ;;  %2036 = vmatpush3.bf16.msra.mxu1 %v2165_v0 }
 0x664   :  { %2037 = vmatprep.subr.bf16.mxu1 %v2299_v1 }
 0x667   :  { %2038 = vmatpush3.bf16.msra.mxu1 %v2166_v2 }
 0x668   :  { %2051 = vmatprep.subr.bf16.mxu1 %v2299_v1 }
 0x735   :  { %v425_v21 = vpop.f32.mrb[4].mxu1 }
 0x736   :  { %v438_v22 = vadd.f32 %v425_v21, %v2403_v20  ;;  %v2025_v23 = vpop.f32.mrb[5].mxu1  ;;  %v431_v27 = vadd.f32 %v425_v21, %v367_v26 }
 0x737   :  { %v428_v24 = vpop.f32.mrb[6].mxu1 }
 0x738   :  { %440 = vrot.lane.b32.xlu1 %v438_v22, %s2301_s26  ;;  %v2026_v25 = vpop.f32.mrb[7].mxu1  ;;  %v1890_v28 = vmul.f32 -1.442695, %v431_v27 }
 0x73a   :  { %2191 = vpow2.f32 %v1890_v28 }
 0x744   :  { %v2192_v29 = vpop.eup %2191 }
 0x745   :  { %v435_v30 = vadd.f32 1.0, %v2192_v29 }
 0x747   :  { %2193 = vrcp.f32 %v435_v30  ;;  %v2167_v30 = vld [vmem:[%s2748_s2] sm:$0xff]  }
 0x751   :  { %v2194_v31 = vpop.eup %2193 }
 0x7aa   :  { %v441_v32 = vpop.permute.xlu1 %440 }
 0x7ab   :  { %v443_v33 = vmul.f32 %v2194_v31, %v441_v32 }
 0x7ad   :  { %445 = vrot.lane.b32.xlu0 %v443_v33, %s2301_s26 }
 0x81f   :  { %v446_v34 = vpop.permute.xlu0 %445 }
 0x820   :  { %v448_v35 = vadd.f32 %v446_v34, %v367_v26 }
 0x822   :  { %2195 = vtanh.f32 %v448_v35 }
 0x82c   :  { %v2196_v36 = vpop.eup %2195 }
 0x82d   :  { %v450_v37 = vsub.f32 %v2443_v17, %v2196_v36 }
 0x82f   :  { %452 = vrot.lane.b32.xlu1 %v450_v37, %s2304_s3 }
 0x8a1   :  { %v453_v40 = vpop.permute.xlu1 %452 }
 0x8a2   :  { %v455_v41 = vmul.f32 %v2194_v31, %v453_v40  ;;  %v2168_v31 = vld [vmem:[%s2748_s2 + $0x8] sm:$0xff]  }
 0x8a4   :  { %457 = vrot.lane.b32.xlu0 %v455_v41, %s2305_s12 }
 0x916   :  { %v458_v42 = vpop.permute.xlu0 %457 }
 0x917   :  { %v2465_v43 = vadd.f32 %v2196_v36, %v458_v42 }
 0x919   :  { %v469_v44 = vpack.c.bf16 %v2465_v43, %v2465_v43 }
 0x91b   :  { %475 = vrot.lane.b32.xlu1 %v469_v44, %s2301_s26  ;;  %v670_v44 = vld [vmem:[#allocation2 + $0xa] sm:$0x3] }
 0x98d   :  { %v476_v45 = vpop.permute.xlu1 %475 }
 0x98e   :  { %2032 = vmatmul.mubr.msk.bf16.vlgmr.msra.gmra.mrb[8].mxu0 %vm182_vm2, %v476_v45 }
 0x98f   :  { %2047 = vmatprep.mubr.msk.bf16.mxu0 %vm2300_vm0, %v2299_v1  ;;  %2044 = vmatpush3.bf16.msra.mxu0 %v2167_v30 }
 0x990   :  { %2045 = vmatprep.subr.bf16.mxu0 %v2299_v1 }
 0x993   :  { %2046 = vmatpush3.bf16.msra.mxu0 %v2168_v31 }
 0x994   :  { %2059 = vmatprep.subr.bf16.mxu0 %v2299_v1 }
 0xa61   :  { %v526_v46 = vpop.f32.mrb[8].mxu0 }
 0xa62   :  { %v539_v47 = vadd.f32 %v526_v46, %v2403_v20  ;;  %v2033_v48 = vpop.f32.mrb[9].mxu0  ;;  %v532_v52 = vadd.f32 %v526_v46, %v468_v51 }
 0xa63   :  { %v529_v49 = vpop.f32.mrb[10].mxu0 }
 0xa64   :  { %541 = vrot.lane.b32.xlu0 %v539_v47, %s2301_s26  ;;  %v2034_v50 = vpop.f32.mrb[11].mxu0  ;;  %v1894_v54 = vmul.f32 -1.442695, %v532_v52 }
 0xa66   :  { %2197 = vpow2.f32 %v1894_v54 }
 0xa70   :  { %v2198_v55 = vpop.eup %2197 }
 0xa71   :  { %v536_v56 = vadd.f32 1.0, %v2198_v55 }
 0xa73   :  { %2199 = vrcp.f32 %v536_v56 }
 0xa7d   :  { %v2200_v57 = vpop.eup %2199 }
 0xad6   :  { %v542_v58 = vpop.permute.xlu0 %541 }
 0xad7   :  { %v544_v59 = vmul.f32 %v2200_v57, %v542_v58  ;;  %v2170_v58 = vld [vmem:[%s2748_s2 + $0x8] sm:$0xff]  }
 0xad9   :  { %546 = vrot.lane.b32.xlu1 %v544_v59, %s2301_s26 }
 0xb4b   :  { %v547_v60 = vpop.permute.xlu1 %546 }
 0xb4c   :  { %v549_v61 = vadd.f32 %v547_v60, %v468_v51 }
 0xb4e   :  { %2201 = vtanh.f32 %v549_v61 }
 0xb58   :  { %v2202_v62 = vpop.eup %2201 }
 0xb59   :  { %v551_v63 = vsub.f32 %v2465_v43, %v2202_v62 }
 0xb5b   :  { %553 = vrot.lane.b32.xlu0 %v551_v63, %s2304_s3 }
 0xbcd   :  { %v554_v3 = vpop.permute.xlu0 %553 }
 0xbce   :  { %v556_v4 = vmul.f32 %v2200_v57, %v554_v3  ;;  %v2169_v57 = vld [vmem:[%s2748_s2] sm:$0xff]  }
 0xbd0   :  { %558 = vrot.lane.b32.xlu1 %v556_v4, %s2305_s12 }
 0xc42   :  { %v559_v5 = vpop.permute.xlu1 %558 }
 0xc43   :  { %v2487_v7 = vadd.f32 %v2202_v62, %v559_v5 }
 0xc45   :  { %v570_v8 = vpack.c.bf16 %v2487_v7, %v2487_v7 }
 0xc47   :  { %576 = vrot.lane.b32.xlu0 %v570_v8, %s2301_s26 }
 0xcb9   :  { %v577_v9 = vpop.permute.xlu0 %576 }
 0xcba   :  { %2040 = vmatmul.mubr.msk.bf16.vlgmr.msra.gmra.mrb[8].mxu1 %vm182_vm2, %v577_v9  ;;  %v771_v9 = vld [vmem:[#allocation2 + $0xc] sm:$0x3] }
 0xcbb   :  { %2055 = vmatprep.mubr.msk.bf16.mxu1 %vm2300_vm0, %v2299_v1  ;;  %2052 = vmatpush3.bf16.msra.mxu1 %v2169_v57 }
 0xcbc   :  { %2053 = vmatprep.subr.bf16.mxu1 %v2299_v1 }
 0xcbf   :  { %2054 = vmatpush3.bf16.msra.mxu1 %v2170_v58  ;;  %v1919_v58 = vld [vmem:[%s2754_s8] ss:$0 sm:$0xff] }
 0xcc0   :  { %2067 = vmatprep.subr.bf16.mxu1 %v2299_v1 }
 0xd8d   :  { %v627_v10 = vpop.f32.mrb[8].mxu1 }
 0xd8e   :  { %v640_v11 = vadd.f32 %v627_v10, %v2403_v20  ;;  %v2041_v12 = vpop.f32.mrb[9].mxu1  ;;  %v633_v18 = vadd.f32 %v627_v10, %v569_v16 }
 0xd8f   :  { %v630_v14 = vpop.f32.mrb[10].mxu1 }
 0xd90   :  { %642 = vrot.lane.b32.xlu1 %v640_v11, %s2301_s26  ;;  %v2042_v15 = vpop.f32.mrb[11].mxu1  ;;  %v1898_v19 = vmul.f32 -1.442695, %v633_v18 }
 0xd92   :  { %2203 = vpow2.f32 %v1898_v19 }
 0xd9c   :  { %v2204_v21 = vpop.eup %2203 }
 0xd9d   :  { %v637_v22 = vadd.f32 1.0, %v2204_v21 }
 0xd9f   :  { %2205 = vrcp.f32 %v637_v22 }
 0xda9   :  { %v2206_v23 = vpop.eup %2205 }
 0xe02   :  { %v643_v24 = vpop.permute.xlu1 %642 }
 0xe03   :  { %v645_v25 = vmul.f32 %v2206_v23, %v643_v24  ;;  %v2171_v24 = vld [vmem:[%s2748_s2] sm:$0xff]  }
 0xe05   :  { %647 = vrot.lane.b32.xlu0 %v645_v25, %s2301_s26  ;;  %v2172_v25 = vld [vmem:[%s2748_s2 + $0x8] sm:$0xff]  }
 0xe77   :  { %v648_v26 = vpop.permute.xlu0 %647 }
 0xe78   :  { %v650_v27 = vadd.f32 %v648_v26, %v569_v16 }
 0xe7a   :  { %2207 = vtanh.f32 %v650_v27 }
 0xe84   :  { %v2208_v28 = vpop.eup %2207 }
 0xe85   :  { %v652_v29 = vsub.f32 %v2487_v7, %v2208_v28 }
 0xe87   :  { %654 = vrot.lane.b32.xlu1 %v652_v29, %s2304_s3 }
 0xef9   :  { %v655_v32 = vpop.permute.xlu1 %654 }
 0xefa   :  { %v657_v33 = vmul.f32 %v2206_v23, %v655_v32 }
 0xefc   :  { %659 = vrot.lane.b32.xlu0 %v657_v33, %s2305_s12 }
 0xf6e   :  { %v660_v34 = vpop.permute.xlu0 %659 }
 0xf6f   :  { %v2509_v35 = vadd.f32 %v2208_v28, %v660_v34 }
 0xf71   :  { %v671_v36 = vpack.c.bf16 %v2509_v35, %v2509_v35 }
 0xf73   :  { %677 = vrot.lane.b32.xlu1 %v671_v36, %s2301_s26 }
 0xfe5   :  { %v678_v37 = vpop.permute.xlu1 %677 }
 0xfe6   :  { %2048 = vmatmul.mubr.msk.bf16.vlgmr.msra.gmra.mrb[12].mxu0 %vm182_vm2, %v678_v37 }
 0xfe7   :  { %2063 = vmatprep.mubr.msk.bf16.mxu0 %vm2300_vm0, %v2299_v1  ;;  %2060 = vmatpush3.bf16.msra.mxu0 %v2171_v24 }
 0xfe8   :  { %2061 = vmatprep.subr.bf16.mxu0 %v2299_v1 }
 0xfeb   :  { %2062 = vmatpush3.bf16.msra.mxu0 %v2172_v25 }
 0xfec   :  { %2075 = vmatprep.subr.bf16.mxu0 %v2299_v1 }
0x10b9   :  { %v728_v38 = vpop.f32.mrb[12].mxu0 }
0x10ba   :  { %v741_v39 = vadd.f32 %v728_v38, %v2403_v20  ;;  %v2049_v40 = vpop.f32.mrb[13].mxu0  ;;  %v734_v45 = vadd.f32 %v728_v38, %v670_v44  ;;  %v872_v38 = vld [vmem:[#allocation2 + $0xe] sm:$0x3] }
0x10bb   :  { %v731_v41 = vpop.f32.mrb[14].mxu0 }
0x10bc   :  { %743 = vrot.lane.b32.xlu0 %v741_v39, %s2301_s26  ;;  %v2050_v42 = vpop.f32.mrb[15].mxu0  ;;  %v1902_v46 = vmul.f32 -1.442695, %v734_v45 }
0x10be   :  { %2209 = vpow2.f32 %v1902_v46 }
0x10c8   :  { %v2210_v47 = vpop.eup %2209 }
0x10c9   :  { %v738_v48 = vadd.f32 1.0, %v2210_v47 }
0x10cb   :  { %2211 = vrcp.f32 %v738_v48 }
0x10d5   :  { %v2212_v49 = vpop.eup %2211 }
0x112e   :  { %v744_v50 = vpop.permute.xlu0 %743 }
0x112f   :  { %v746_v51 = vmul.f32 %v2212_v49, %v744_v50 }
0x1131   :  { %748 = vrot.lane.b32.xlu1 %v746_v51, %s2301_s26 }
0x11a3   :  { %v749_v52 = vpop.permute.xlu1 %748 }
0x11a4   :  { %v751_v54 = vadd.f32 %v749_v52, %v670_v44  ;;  %v2571_v52 = vld [vmem:[%s2752_s6] sm:$0xff]  }
0x11a6   :  { %2213 = vtanh.f32 %v751_v54 }
0x11b0   :  { %v2214_v55 = vpop.eup %2213 }
0x11b1   :  { %v753_v56 = vsub.f32 %v2509_v35, %v2214_v55 }
0x11b3   :  { %755 = vrot.lane.b32.xlu0 %v753_v56, %s2304_s3 }
0x1225   :  { %v756_v59 = vpop.permute.xlu0 %755 }
0x1226   :  { %v758_v60 = vmul.f32 %v2212_v49, %v756_v59 }
0x1228   :  { %760 = vrot.lane.b32.xlu1 %v758_v60, %s2305_s12 }
0x129a   :  { %v761_v61 = vpop.permute.xlu1 %760 }
0x129b   :  { %v2531_v62 = vadd.f32 %v2214_v55, %v761_v61 }
0x129d   :  { %v772_v63 = vpack.c.bf16 %v2531_v62, %v2531_v62 }
0x129f   :  { %778 = vrot.lane.b32.xlu0 %v772_v63, %s2301_s26 }
0x1311   :  { %v779_v0 = vpop.permute.xlu0 %778 }
0x1312   :  { %2056 = vmatmul.mubr.msk.bf16.vlgmr.msra.gmra.mrb[12].mxu1 %vm182_vm2, %v779_v0 }
0x1313   :  { %2071 = vmatprep.mubr.msk.bf16.mxu1 %vm2300_vm0, %v2299_v1 }
0x13e5   :  { %v829_v2 = vpop.f32.mrb[12].mxu1 }
0x13e6   :  { %v842_v3 = vadd.f32 %v829_v2, %v2403_v20  ;;  %v2057_v4 = vpop.f32.mrb[13].mxu1  ;;  %v835_v10 = vadd.f32 %v829_v2, %v771_v9 }
0x13e7   :  { %v832_v5 = vpop.f32.mrb[14].mxu1 }
0x13e8   :  { %844 = vrot.lane.b32.xlu1 %v842_v3, %s2301_s26  ;;  %v2058_v8 = vpop.f32.mrb[15].mxu1  ;;  %v1906_v11 = vmul.f32 -1.442695, %v835_v10 }
0x13ea   :  { %2215 = vpow2.f32 %v1906_v11 }
0x13f4   :  { %v2216_v12 = vpop.eup %2215 }
0x13f5   :  { %v839_v14 = vadd.f32 1.0, %v2216_v12 }
0x13f7   :  { %2217 = vrcp.f32 %v839_v14 }
0x1401   :  { %v2218_v15 = vpop.eup %2217 }
0x145a   :  { %v845_v16 = vpop.permute.xlu1 %844 }
0x145b   :  { %v847_v18 = vmul.f32 %v2218_v15, %v845_v16 }
0x145d   :  { %849 = vrot.lane.b32.xlu0 %v847_v18, %s2301_s26 }
0x14cf   :  { %v850_v19 = vpop.permute.xlu0 %849 }
0x14d0   :  { %v852_v21 = vadd.f32 %v850_v19, %v771_v9 }
0x14d2   :  { %2219 = vtanh.f32 %v852_v21 }
0x14dc   :  { %v2220_v22 = vpop.eup %2219 }
0x14dd   :  { %v854_v23 = vsub.f32 %v2531_v62, %v2220_v22 }
0x14df   :  { %856 = vrot.lane.b32.xlu1 %v854_v23, %s2304_s3 }
0x1551   :  { %v857_v26 = vpop.permute.xlu1 %856 }
0x1552   :  { %v859_v27 = vmul.f32 %v2218_v15, %v857_v26 }
0x1554   :  { %861 = vrot.lane.b32.xlu0 %v859_v27, %s2305_s12 }
0x15c6   :  { %v862_v28 = vpop.permute.xlu0 %861 }
0x15c7   :  { %v864_v29 = vadd.f32 %v2220_v22, %v862_v28 }
0x15c9   :  { %v873_v30 = vpack.c.bf16 %v864_v29, %v864_v29 }
0x15cb   :  { %879 = vrot.lane.b32.xlu1 %v873_v30, %s2301_s26 }
0x163d   :  { %v880_v31 = vpop.permute.xlu1 %879 }
0x163e   :  { %2064 = vmatmul.mubr.msk.bf16.vlgmr.msra.gmra.mrb[16].mxu0 %vm182_vm2, %v880_v31 }
0x163f   :  { %2079 = vmatprep.mubr.msk.bf16.mxu0 %vm2300_vm0, %v2299_v1  ;;  %2076 = vmatpush3.bf16.msra.mxu0 %v2571_v52 }
0x1640   :  { %2077 = vmatprep.subr.bf16.mxu0 %v2299_v1 }
0x1711   :  { %v930_v32 = vpop.f32.mrb[16].mxu0 }
0x1712   :  { %v943_v33 = vadd.f32 %v930_v32, %v2403_v20  ;;  %v2065_v34 = vpop.f32.mrb[17].mxu0  ;;  %v936_v39 = vadd.f32 %v930_v32, %v872_v38 }
0x1713   :  { %v933_v36 = vpop.f32.mrb[18].mxu0 }
0x1714   :  { %945 = vrot.lane.b32.xlu0 %v943_v33, %s2301_s26  ;;  %v2066_v37 = vpop.f32.mrb[19].mxu0  ;;  %v1910_v40 = vmul.f32 -1.442695, %v936_v39 }
0x1716   :  { %2221 = vpow2.f32 %v1910_v40 }
0x1720   :  { %v2222_v41 = vpop.eup %2221 }
0x1721   :  { %v940_v42 = vadd.f32 1.0, %v2222_v41 }
0x1723   :  { %2223 = vrcp.f32 %v940_v42 }
0x172d   :  { %v2224_v44 = vpop.eup %2223 }
0x1786   :  { %v946_v45 = vpop.permute.xlu0 %945 }
0x1787   :  { %v948_v46 = vmul.f32 %v2224_v44, %v946_v45 }
0x1789   :  { %950 = vrot.lane.b32.xlu1 %v948_v46, %s2301_s26 }
0x17fb   :  { %v951_v47 = vpop.permute.xlu1 %950 }
0x17fc   :  { %v953_v48 = vadd.f32 %v951_v47, %v872_v38 }
0x17fe   :  { %2225 = vtanh.f32 %v953_v48 }
0x1808   :  { %v2226_v20 = vpop.eup %2225 }
0x1809   :  { %v955_v49 = vsub.f32 %v864_v29, %v2226_v20 }
0x180b   :  { %957 = vrot.lane.b32.xlu0 %v955_v49, %s2304_s3 }
0x180f   :  { %260 = vrot.lane.b32.xlu0 %v2421_v53, %s2301_s26  ;;  %v2578_v53 = vld [vmem:[%s2752_s6 + $0x8] sm:$0xff]  }
0x1810   :  { %2078 = vmatpush3.bf16.msra.mxu0 %v2578_v53 }
0x1811   :  { %2091 = vmatprep.subr.bf16.mxu0 %v2299_v1 }
0x1813   :  { %462 = vrot.lane.b32.xlu0 %v2465_v43, %s2301_s26  ;;  %2080 = vmatmul.mubr.bf16.vlgmr.msra.gmra.mrb[20].mxu0 %v2302_v6  ;;  %v2175_v6 = vld [vmem:[%s2751_s5] sm:$0xff]  }
0x1814   :  { %2092 = vmatpush3.bf16.msra.mxu0 %v2571_v52  ;;  %2095 = vmatprep.mubr.msk.bf16.mxu0 %vm2300_vm0, %v2299_v1 }
0x1815   :  { %2093 = vmatprep.subr.bf16.mxu0 %v2299_v1  ;;  %2068 = vmatpush3.bf16.msra.mxu1 %v2175_v6 }
0x1816   :  { %2069 = vmatprep.subr.bf16.mxu1 %v2299_v1 }
0x1817   :  { %664 = vrot.lane.b32.xlu0 %v2509_v35, %s2301_s26 }
0x1818   :  { %2094 = vmatpush3.bf16.msra.mxu0 %v2578_v53 }
0x1819   :  { %2107 = vmatprep.subr.bf16.mxu0 %v2299_v1 }
0x181b   :  { %866 = vrot.lane.b32.xlu0 %v864_v29, %s2301_s26  ;;  %v1911_v29 = vld [vmem:[%s2753_s7] ss:$0 sm:$0xff] }
0x181f   :  { %1214 = vrot.lane.b32.xlu0 %v1919_v58, %s2301_s26 }
0x187d   :  { %v958_v50 = vpop.permute.xlu0 %957 }
0x187e   :  { %v960_v51 = vmul.f32 %v2224_v44, %v958_v50 }
0x1880   :  { %962 = vrot.lane.b32.xlu1 %v960_v51, %s2305_s12 }
0x1881   :  { %v261_v54 = vpop.permute.xlu0 %260 }
0x1882   :  { %264 = vst.msk [vmem:[#allocation3] sm:$0x3] %vm263_vm3, %v261_v54 }
0x1884   :  { %361 = vrot.lane.b32.xlu1 %v2443_v17, %s2301_s26 }
0x1885   :  { %v463_v43 = vpop.permute.xlu0 %462 }
0x1886   :  { %466 = vst.msk [vmem:[#allocation3 + $0x4] sm:$0x3] %vm263_vm3, %v463_v43 }
0x1888   :  { %563 = vrot.lane.b32.xlu1 %v2487_v7, %s2301_s26  ;;  %v2176_v7 = vld [vmem:[%s2751_s5 + $0x8] sm:$0xff]  }
0x1889   :  { %v665_v35 = vpop.permute.xlu0 %664  ;;  %2070 = vmatpush3.bf16.msra.mxu1 %v2176_v7  ;;  %v972_v12 = vld [vmem:[#allocation3] sm:$0x3] }
0x188a   :  { %668 = vst.msk [vmem:[#allocation3 + $0x8] sm:$0x3] %vm263_vm3, %v665_v35  ;;  %2083 = vmatprep.subr.bf16.mxu1 %v2299_v1 }
0x188c   :  { %765 = vrot.lane.b32.xlu1 %v2531_v62, %s2301_s26 }
0x188d   :  { %v867_v17 = vpop.permute.xlu0 %866  ;;  %v974_v5 = vld [vmem:[#allocation3 + $0x4] sm:$0x3] }
0x188e   :  { %870 = vst.msk [vmem:[#allocation3 + $0xc] sm:$0x3] %vm263_vm3, %v867_v17 }
0x1891   :  { %v2617_v9 = vpop.permute.xlu0 %1214  ;;  %v976_v14 = vld [vmem:[#allocation3 + $0x8] sm:$0x3] }
0x1895   :  { %v978_v18 = vld [vmem:[#allocation3 + $0xc] sm:$0x3] }
0x18e6   :  { %v1201_v61 = vpop.f32.mrb[20].mxu0 }
0x18e7   :  { %v2081_v62 = vpop.f32.mrb[21].mxu0  ;;  %v1217_v11 = vadd.f32 %v2617_v9, %v1201_v61 }
0x18e8   :  { %v1204_v63 = vpop.f32.mrb[22].mxu0 }
0x18e9   :  { %v2082_v0 = vpop.f32.mrb[23].mxu0 }
0x18f2   :  { %v963_v55 = vpop.permute.xlu1 %962 }
0x18f3   :  { %v965_v56 = vadd.f32 %v2226_v20, %v963_v55 }
0x18f5   :  { %967 = vrot.lane.b32.xlu1 %v965_v56, %s2301_s26 }
0x18f6   :  { %v362_v57 = vpop.permute.xlu1 %361 }
0x18f7   :  { %365 = vst.msk [vmem:[#allocation3 + $0x2] sm:$0x3] %vm263_vm3, %v362_v57 }
0x18f9   :  { %1219 = vrot.lane.b32.xlu1 %v1217_v11, %s2301_s26 }
0x18fa   :  { %v564_v59 = vpop.permute.xlu1 %563 }
0x18fb   :  { %567 = vst.msk [vmem:[#allocation3 + $0x6] sm:$0x3] %vm263_vm3, %v564_v59 }
0x18fe   :  { %v766_v60 = vpop.permute.xlu1 %765  ;;  %v973_v4 = vld [vmem:[#allocation3 + $0x2] sm:$0x3] }
0x18ff   :  { %769 = vst.msk [vmem:[#allocation3 + $0xa] sm:$0x3] %vm263_vm3, %v766_v60  ;;  %v988_v15 = vcombine.low %v972_v12, %v973_v4 }
0x1901   :  { %v996_v23 = vrot.slane %v988_v15, %v2400_v13 }
0x1902   :  { %v975_v3 = vld [vmem:[#allocation3 + $0x6] sm:$0x3] }
0x1903   :  { %v989_v10 = vcombine.low %v974_v5, %v975_v3 }
0x1905   :  { %v1003_v21 = vrot.slane %v989_v10, %v2400_v13 }
0x1906   :  { %v977_v8 = vld [vmem:[#allocation3 + $0xa] sm:$0x3] }
0x1907   :  { %v1005_v16 = vcombine.low %v976_v14, %v977_v8  ;;  %v1004_v26 = vcombine.low %v996_v23, %v1003_v21 }
0x1909   :  { %v1013_v24 = vrot.slane %v1005_v16, %v2400_v13 }
0x1967   :  { %v968_v2 = vpop.permute.xlu1 %967 }
0x1968   :  { %971 = vst.msk [vmem:[#allocation3 + $0xe] sm:$0x3] %vm263_vm3, %v968_v2 }
0x196b   :  { %v1220_v54 = vpop.permute.xlu1 %1219 }
0x196f   :  { %v979_v19 = vld [vmem:[#allocation3 + $0xe] sm:$0x3] }
0x1970   :  { %v1006_v22 = vcombine.low %v978_v18, %v979_v19 }
0x1972   :  { %v1020_v25 = vrot.slane %v1006_v22, %v2400_v13 }
0x1974   :  { %v1021_v27 = vcombine.low %v1013_v24, %v1020_v25 }
0x1976   :  { %v1024_v28 = vpack.c.bf16 %v1021_v27, %v1004_v26 }
0x1978   :  { %2072 = vmatmul.mubr.msk.bf16.vlgmr.msra.gmra.mrb[16].mxu1 %vm182_vm2, %v1024_v28 }
0x1979   :  { %2084 = vmatpush3.bf16.msra.mxu1 %v2571_v52  ;;  %2087 = vmatprep.mubr.msk.bf16.mxu1 %vm2300_vm0, %v2299_v1 }
0x197a   :  { %2085 = vmatprep.subr.bf16.mxu1 %v2299_v1 }
0x197d   :  { %2086 = vmatpush3.bf16.msra.mxu1 %v2578_v53 }
0x197e   :  { %2099 = vmatprep.subr.bf16.mxu1 %v2299_v1 }
0x1a4b   :  { %v1085_v30 = vpop.f32.mrb[16].mxu1 }
0x1a4c   :  { %v1086_v31 = vadd.f32 %v1911_v29, %v1085_v30  ;;  %v2073_v32 = vpop.f32.mrb[17].mxu1 }
0x1a4d   :  { %v1088_v33 = vpop.f32.mrb[18].mxu1 }
0x1a4e   :  { %v1094_v34 = vcombine.high %v1086_v31, %v1086_v31  ;;  %v1101_v36 = vrot.slane %v1086_v31, %v2400_v13  ;;  %1915 = vst.sshfl [vmem:[#allocation2] sm:$0x3 pattern:$0x76325410] %v1086_v31  ;;  %v1089_v37 = vadd.f32 %v1911_v29, %v1088_v33  ;;  %v2074_v38 = vpop.f32.mrb[19].mxu1 }
0x1a50   :  { %v1108_v39 = vrot.slane %v1094_v34, %v2400_v13  ;;  %v1109_v40 = vcombine.high %v1101_v36, %v1101_v36  ;;  %1916 = vst.sshfl [vmem:[#allocation2 + $0x4] sm:$0x3 pattern:$0x76325410] %v1094_v34  ;;  %v1111_v41 = vcombine.high %v1089_v37, %v1089_v37  ;;  %v1118_v42 = vrot.slane %v1089_v37, %v2400_v13 }
0x1a51   :  { %1917 = vst.sshfl [vmem:[#allocation2 + $0x8] sm:$0x3 pattern:$0x76325410] %v1089_v37 }
0x1a52   :  { %v1110_v44 = vcombine.high %v1108_v39, %v1108_v39  ;;  %1137 = vst [vmem:[#allocation2 + $0x2] sm:$0x3] %v1109_v40  ;;  %v1125_v45 = vrot.slane %v1111_v41, %v2400_v13  ;;  %v1126_v46 = vcombine.high %v1118_v42, %v1118_v42  ;;  %1918 = vst.sshfl [vmem:[#allocation2 + $0xc] sm:$0x3 pattern:$0x76325410] %v1111_v41 }
0x1a54   :  { %1139 = vst [vmem:[#allocation2 + $0x6] sm:$0x3] %v1110_v44  ;;  %v1127_v47 = vcombine.high %v1125_v45, %v1125_v45  ;;  %1141 = vst [vmem:[#allocation2 + $0xa] sm:$0x3] %v1126_v46 }
0x1a55   :  { %v1150_v48 = vld [vmem:[#allocation2] sm:$0x3] }
0x1a56   :  { %1143 = vst [vmem:[#allocation2 + $0xe] sm:$0x3] %v1127_v47  ;;  %v1207_v20 = vadd.f32 %v1201_v61, %v1150_v48 }
0x1a57   :  { %v1318_v32 = vld [vmem:[#allocation2 + $0x4] sm:$0x3] }
0x1a58   :  { %v1922_v49 = vmul.f32 -1.442695, %v1207_v20 }
0x1a59   :  { %v1240_v3 = vld [vmem:[#allocation2 + $0x2] sm:$0x3] }
0x1a5a   :  { %2227 = vpow2.f32 %v1922_v49 }
0x1a64   :  { %v2228_v50 = vpop.eup %2227 }
0x1a65   :  { %v1211_v51 = vadd.f32 1.0, %v2228_v50 }
0x1a67   :  { %2229 = vrcp.f32 %v1211_v51 }
0x1a71   :  { %v2230_v43 = vpop.eup %2229 }
0x1a72   :  { %v1222_v35 = vmul.f32 %v2230_v43, %v1220_v54 }
0x1a74   :  { %1224 = vrot.lane.b32.xlu0 %v1222_v35, %s2301_s26 }
0x1ae6   :  { %v1225_v17 = vpop.permute.xlu0 %1224 }
0x1ae7   :  { %v1227_v13 = vadd.f32 %v1225_v17, %v1150_v48 }
0x1ae9   :  { %2231 = vtanh.f32 %v1227_v13  ;;  %v1396_v13 = vld [vmem:[#allocation2 + $0x6] sm:$0x3] }
0x1af3   :  { %v2232_v6 = vpop.eup %2231 }
0x1af4   :  { %v1229_v7 = vsub.f32 0.0, %v2232_v6 }
0x1af6   :  { %1231 = vrot.lane.b32.xlu1 %v1229_v7, %s2304_s3 }
0x1b68   :  { %v1232_v55 = vpop.permute.xlu1 %1231 }
0x1b69   :  { %v1234_v56 = vmul.f32 %v2230_v43, %v1232_v55 }
0x1b6b   :  { %1236 = vrot.lane.b32.xlu0 %v1234_v56, %s2305_s12 }
0x1bdd   :  { %v1237_v57 = vpop.permute.xlu0 %1236 }
0x1bde   :  { %v1239_v58 = vadd.f32 %v2232_v6, %v1237_v57 }
0x1be0   :  { %v1241_v59 = vpack.c.bf16 %v1239_v58, %v1239_v58 }
0x1be2   :  { %1243 = vrot.lane.b32.xlu1 %v1241_v59, %s2301_s26 }
0x1c54   :  { %v1244_v60 = vpop.permute.xlu1 %1243 }
0x1c55   :  { %2088 = vmatmul.mubr.msk.bf16.vlgmr.msra.gmra.mrb[20].mxu1 %vm182_vm2, %v1244_v60 }
0x1c56   :  { %2100 = vmatpush3.bf16.msra.mxu1 %v2571_v52  ;;  %2103 = vmatprep.mubr.msk.bf16.mxu1 %vm2300_vm0, %v2299_v1 }
0x1c57   :  { %2101 = vmatprep.subr.bf16.mxu1 %v2299_v1 }
0x1c5a   :  { %2102 = vmatpush3.bf16.msra.mxu1 %v2578_v53 }
0x1c5b   :  { %2115 = vmatprep.subr.bf16.mxu1 %v2299_v1 }
0x1d28   :  { %v1282_v61 = vpop.f32.mrb[20].mxu1 }
0x1d29   :  { %v1295_v62 = vadd.f32 %v1282_v61, %v2617_v9  ;;  %v2089_v63 = vpop.f32.mrb[21].mxu1  ;;  %v1288_v4 = vadd.f32 %v1282_v61, %v1240_v3 }
0x1d2a   :  { %v1285_v0 = vpop.f32.mrb[22].mxu1 }
0x1d2b   :  { %1297 = vrot.lane.b32.xlu0 %v1295_v62, %s2301_s26  ;;  %v2090_v2 = vpop.f32.mrb[23].mxu1  ;;  %v1924_v5 = vmul.f32 -1.442695, %v1288_v4 }
0x1d2d   :  { %2233 = vpow2.f32 %v1924_v5 }
0x1d37   :  { %v2234_v8 = vpop.eup %2233 }
0x1d38   :  { %v1292_v10 = vadd.f32 1.0, %v2234_v8 }
0x1d3a   :  { %2235 = vrcp.f32 %v1292_v10 }
0x1d44   :  { %v2236_v11 = vpop.eup %2235 }
0x1d9d   :  { %v1298_v12 = vpop.permute.xlu0 %1297 }
0x1d9e   :  { %v1300_v14 = vmul.f32 %v2236_v11, %v1298_v12 }
0x1da0   :  { %1302 = vrot.lane.b32.xlu1 %v1300_v14, %s2301_s26 }
0x1e12   :  { %v1303_v15 = vpop.permute.xlu1 %1302 }
0x1e13   :  { %v1305_v16 = vadd.f32 %v1303_v15, %v1240_v3 }
0x1e15   :  { %2237 = vtanh.f32 %v1305_v16  ;;  %v1474_v16 = vld [vmem:[#allocation2 + $0x8] sm:$0x3] }
0x1e1f   :  { %v2238_v18 = vpop.eup %2237 }
0x1e20   :  { %v1307_v19 = vsub.f32 %v1239_v58, %v2238_v18 }
0x1e22   :  { %1309 = vrot.lane.b32.xlu0 %v1307_v19, %s2304_s3 }
0x1e94   :  { %v1310_v21 = vpop.permute.xlu0 %1309 }
0x1e95   :  { %v1312_v22 = vmul.f32 %v2236_v11, %v1310_v21 }
0x1e97   :  { %1314 = vrot.lane.b32.xlu1 %v1312_v22, %s2305_s12 }
0x1f09   :  { %v1315_v23 = vpop.permute.xlu1 %1314 }
0x1f0a   :  { %v1317_v24 = vadd.f32 %v2238_v18, %v1315_v23 }
0x1f0c   :  { %v1319_v25 = vpack.c.bf16 %v1317_v24, %v1317_v24 }
0x1f0e   :  { %1321 = vrot.lane.b32.xlu0 %v1319_v25, %s2301_s26 }
0x1f80   :  { %v1322_v26 = vpop.permute.xlu0 %1321 }
0x1f81   :  { %2096 = vmatmul.mubr.msk.bf16.vlgmr.msra.gmra.mrb[24].mxu0 %vm182_vm2, %v1322_v26 }
0x1f82   :  { %2108 = vmatpush3.bf16.msra.mxu0 %v2571_v52  ;;  %2111 = vmatprep.mubr.msk.bf16.mxu0 %vm2300_vm0, %v2299_v1 }
0x1f83   :  { %2109 = vmatprep.subr.bf16.mxu0 %v2299_v1 }
0x1f86   :  { %2110 = vmatpush3.bf16.msra.mxu0 %v2578_v53 }
0x1f87   :  { %2123 = vmatprep.subr.bf16.mxu0 %v2299_v1 }
0x2054   :  { %v1360_v27 = vpop.f32.mrb[24].mxu0 }
0x2055   :  { %v1373_v28 = vadd.f32 %v1360_v27, %v2617_v9  ;;  %v2097_v29 = vpop.f32.mrb[25].mxu0  ;;  %v1366_v33 = vadd.f32 %v1360_v27, %v1318_v32 }
0x2056   :  { %v1363_v30 = vpop.f32.mrb[26].mxu0 }
0x2057   :  { %1375 = vrot.lane.b32.xlu1 %v1373_v28, %s2301_s26  ;;  %v2098_v31 = vpop.f32.mrb[27].mxu0  ;;  %v1926_v34 = vmul.f32 -1.442695, %v1366_v33 }
0x2059   :  { %2239 = vpow2.f32 %v1926_v34 }
0x2063   :  { %v2240_v36 = vpop.eup %2239 }
0x2064   :  { %v1370_v37 = vadd.f32 1.0, %v2240_v36 }
0x2066   :  { %2241 = vrcp.f32 %v1370_v37 }
0x2070   :  { %v2242_v38 = vpop.eup %2241 }
0x20c9   :  { %v1376_v39 = vpop.permute.xlu1 %1375 }
0x20ca   :  { %v1378_v40 = vmul.f32 %v2242_v38, %v1376_v39 }
0x20cc   :  { %1380 = vrot.lane.b32.xlu0 %v1378_v40, %s2301_s26 }
0x213e   :  { %v1381_v41 = vpop.permute.xlu0 %1380 }
0x213f   :  { %v1383_v42 = vadd.f32 %v1381_v41, %v1318_v32 }
0x2141   :  { %2243 = vtanh.f32 %v1383_v42  ;;  %v1552_v42 = vld [vmem:[#allocation2 + $0xa] sm:$0x3] }
0x214b   :  { %v2244_v44 = vpop.eup %2243 }
0x214c   :  { %v1385_v45 = vsub.f32 %v1317_v24, %v2244_v44 }
0x214e   :  { %1387 = vrot.lane.b32.xlu1 %v1385_v45, %s2304_s3 }
0x21c0   :  { %v1388_v46 = vpop.permute.xlu1 %1387 }
0x21c1   :  { %v1390_v47 = vmul.f32 %v2242_v38, %v1388_v46 }
0x21c3   :  { %1392 = vrot.lane.b32.xlu0 %v1390_v47, %s2305_s12 }
0x2235   :  { %v1393_v48 = vpop.permute.xlu0 %1392 }
0x2236   :  { %v1395_v20 = vadd.f32 %v2244_v44, %v1393_v48 }
0x2238   :  { %v1397_v49 = vpack.c.bf16 %v1395_v20, %v1395_v20 }
0x223a   :  { %1399 = vrot.lane.b32.xlu1 %v1397_v49, %s2301_s26 }
0x22ac   :  { %v1400_v50 = vpop.permute.xlu1 %1399 }
0x22ad   :  { %2104 = vmatmul.mubr.msk.bf16.vlgmr.msra.gmra.mrb[24].mxu1 %vm182_vm2, %v1400_v50 }
0x22ae   :  { %2116 = vmatpush3.bf16.msra.mxu1 %v2571_v52  ;;  %2119 = vmatprep.mubr.msk.bf16.mxu1 %vm2300_vm0, %v2299_v1 }
0x22af   :  { %2117 = vmatprep.subr.bf16.mxu1 %v2299_v1 }
0x22b2   :  { %2118 = vmatpush3.bf16.msra.mxu1 %v2578_v53 }
0x22b3   :  { %2131 = vmatprep.subr.bf16.mxu1 %v2299_v1 }
0x2380   :  { %v1438_v51 = vpop.f32.mrb[24].mxu1 }
0x2381   :  { %v1451_v54 = vadd.f32 %v1438_v51, %v2617_v9  ;;  %v2105_v43 = vpop.f32.mrb[25].mxu1  ;;  %v1444_v6 = vadd.f32 %v1438_v51, %v1396_v13 }
0x2382   :  { %v1441_v35 = vpop.f32.mrb[26].mxu1 }
0x2383   :  { %1453 = vrot.lane.b32.xlu0 %v1451_v54, %s2301_s26  ;;  %v2106_v17 = vpop.f32.mrb[27].mxu1  ;;  %v1928_v7 = vmul.f32 -1.442695, %v1444_v6 }
0x2385   :  { %2245 = vpow2.f32 %v1928_v7 }
0x238f   :  { %v2246_v55 = vpop.eup %2245 }
0x2390   :  { %v1448_v56 = vadd.f32 1.0, %v2246_v55 }
0x2392   :  { %2247 = vrcp.f32 %v1448_v56 }
0x239c   :  { %v2248_v57 = vpop.eup %2247 }
0x23f5   :  { %v1454_v58 = vpop.permute.xlu0 %1453 }
0x23f6   :  { %v1456_v59 = vmul.f32 %v2248_v57, %v1454_v58 }
0x23f8   :  { %1458 = vrot.lane.b32.xlu1 %v1456_v59, %s2301_s26  ;;  %v1630_v59 = vld [vmem:[#allocation2 + $0xc] sm:$0x3] }
0x246a   :  { %v1459_v60 = vpop.permute.xlu1 %1458 }
0x246b   :  { %v1461_v61 = vadd.f32 %v1459_v60, %v1396_v13 }
0x246d   :  { %2249 = vtanh.f32 %v1461_v61 }
0x2477   :  { %v2250_v62 = vpop.eup %2249 }
0x2478   :  { %v1463_v63 = vsub.f32 %v1395_v20, %v2250_v62 }
0x247a   :  { %1465 = vrot.lane.b32.xlu0 %v1463_v63, %s2304_s3 }
0x24ec   :  { %v1466_v0 = vpop.permute.xlu0 %1465 }
0x24ed   :  { %v1468_v2 = vmul.f32 %v2248_v57, %v1466_v0 }
0x24ef   :  { %1470 = vrot.lane.b32.xlu1 %v1468_v2, %s2305_s12 }
0x2561   :  { %v1471_v3 = vpop.permute.xlu1 %1470 }
0x2562   :  { %v1473_v4 = vadd.f32 %v2250_v62, %v1471_v3 }
0x2564   :  { %v1475_v5 = vpack.c.bf16 %v1473_v4, %v1473_v4 }
0x2566   :  { %1477 = vrot.lane.b32.xlu0 %v1475_v5, %s2301_s26 }
0x25d8   :  { %v1478_v8 = vpop.permute.xlu0 %1477 }
0x25d9   :  { %2112 = vmatmul.mubr.msk.bf16.vlgmr.msra.gmra.mrb[28].mxu0 %vm182_vm2, %v1478_v8 }
0x25da   :  { %2124 = vmatpush3.bf16.msra.mxu0 %v2571_v52  ;;  %2127 = vmatprep.mubr.msk.bf16.mxu0 %vm2300_vm0, %v2299_v1 }
0x25db   :  { %2125 = vmatprep.subr.bf16.mxu0 %v2299_v1 }
0x25de   :  { %2126 = vmatpush3.bf16.msra.mxu0 %v2578_v53 }
0x25df   :  { %2139 = vmatprep.subr.bf16.mxu0 %v2299_v1 }
0x26ac   :  { %v1516_v10 = vpop.f32.mrb[28].mxu0 }
0x26ad   :  { %v1529_v11 = vadd.f32 %v1516_v10, %v2617_v9  ;;  %v2113_v12 = vpop.f32.mrb[29].mxu0  ;;  %v1522_v18 = vadd.f32 %v1516_v10, %v1474_v16 }
0x26ae   :  { %v1519_v14 = vpop.f32.mrb[30].mxu0 }
0x26af   :  { %1531 = vrot.lane.b32.xlu1 %v1529_v11, %s2301_s26  ;;  %v2114_v15 = vpop.f32.mrb[31].mxu0  ;;  %v1930_v19 = vmul.f32 -1.442695, %v1522_v18 }
0x26b1   :  { %2251 = vpow2.f32 %v1930_v19 }
0x26bb   :  { %v2252_v21 = vpop.eup %2251 }
0x26bc   :  { %v1526_v22 = vadd.f32 1.0, %v2252_v21 }
0x26be   :  { %2253 = vrcp.f32 %v1526_v22 }
0x26c8   :  { %v2254_v23 = vpop.eup %2253 }
0x2721   :  { %v1532_v24 = vpop.permute.xlu1 %1531 }
0x2722   :  { %v1534_v25 = vmul.f32 %v2254_v23, %v1532_v24 }
0x2724   :  { %1536 = vrot.lane.b32.xlu0 %v1534_v25, %s2301_s26  ;;  %v1708_v25 = vld [vmem:[#allocation2 + $0xe] sm:$0x3] }
0x2796   :  { %v1537_v26 = vpop.permute.xlu0 %1536 }
0x2797   :  { %v1539_v27 = vadd.f32 %v1537_v26, %v1474_v16 }
0x2799   :  { %2255 = vtanh.f32 %v1539_v27 }
0x27a3   :  { %v2256_v28 = vpop.eup %2255 }
0x27a4   :  { %v1541_v29 = vsub.f32 %v1473_v4, %v2256_v28 }
0x27a6   :  { %1543 = vrot.lane.b32.xlu1 %v1541_v29, %s2304_s3 }
0x2818   :  { %v1544_v30 = vpop.permute.xlu1 %1543 }
0x2819   :  { %v1546_v31 = vmul.f32 %v2254_v23, %v1544_v30 }
0x281b   :  { %1548 = vrot.lane.b32.xlu0 %v1546_v31, %s2305_s12 }
0x288d   :  { %v1549_v32 = vpop.permute.xlu0 %1548 }
0x288e   :  { %v1551_v33 = vadd.f32 %v2256_v28, %v1549_v32 }
0x2890   :  { %v1553_v34 = vpack.c.bf16 %v1551_v33, %v1551_v33 }
0x2892   :  { %1555 = vrot.lane.b32.xlu1 %v1553_v34, %s2301_s26 }
0x2904   :  { %v1556_v36 = vpop.permute.xlu1 %1555 }
0x2905   :  { %2120 = vmatmul.mubr.msk.bf16.vlgmr.msra.gmra.mrb[28].mxu1 %vm182_vm2, %v1556_v36 }
0x2906   :  { %2132 = vmatpush3.bf16.msra.mxu1 %v2571_v52  ;;  %2135 = vmatprep.mubr.msk.bf16.mxu1 %vm2300_vm0, %v2299_v1 }
0x2907   :  { %2133 = vmatprep.subr.bf16.mxu1 %v2299_v1 }
0x290a   :  { %2134 = vmatpush3.bf16.msra.mxu1 %v2578_v53 }
0x29d8   :  { %v1594_v37 = vpop.f32.mrb[28].mxu1 }
0x29d9   :  { %v1607_v38 = vadd.f32 %v1594_v37, %v2617_v9  ;;  %v2121_v39 = vpop.f32.mrb[29].mxu1  ;;  %v1600_v44 = vadd.f32 %v1594_v37, %v1552_v42  ;;  %v2177_v37 = vld [vmem:[%s2755_s9] sm:$0xff]  }
0x29da   :  { %v1597_v40 = vpop.f32.mrb[30].mxu1 }
0x29db   :  { %1609 = vrot.lane.b32.xlu0 %v1607_v38, %s2301_s26  ;;  %v2122_v41 = vpop.f32.mrb[31].mxu1  ;;  %v1932_v45 = vmul.f32 -1.442695, %v1600_v44  ;;  %v2178_v38 = vld [vmem:[%s2755_s9 + $0x8] sm:$0xff]   ;;  %s2306_s9 = smov [#allocation4]  }
0x29dc   :  { %s1863_s27 = sshll.u32 %s2306_s9, 4  ;;  %s1864_s27 = int_to_ptr.vmem [resolvable:$true] %s1863_s27 }
0x29dd   :  { %2257 = vpow2.f32 %v1932_v45  ;;  %p2280_p1 = scmp.lt.s32.totalorder %s1864_s27, %s1864_s27 }
0x29e7   :  { %v2258_v52 = vpop.eup %2257 }
0x29e8   :  { %v1604_v46 = vadd.f32 1.0, %v2258_v52  ;;  %v1937_v52 = vld [vmem:[%s2756_s10] ss:$0 sm:$0xff] }
0x29ea   :  { %2259 = vrcp.f32 %v1604_v46 }
0x29f4   :  { %v2260_v47 = vpop.eup %2259 }
0x2a4d   :  { %v1610_v48 = vpop.permute.xlu0 %1609 }
0x2a4e   :  { %v1612_v20 = vmul.f32 %v2260_v47, %v1610_v48 }
0x2a50   :  { %1614 = vrot.lane.b32.xlu1 %v1612_v20, %s2301_s26 }
0x2ac2   :  { %v1615_v53 = vpop.permute.xlu1 %1614 }
0x2ac3   :  { %v1617_v49 = vadd.f32 %v1615_v53, %v1552_v42 }
0x2ac5   :  { %2261 = vtanh.f32 %v1617_v49 }
0x2acf   :  { %v2262_v50 = vpop.eup %2261 }
0x2ad0   :  { %v1619_v51 = vsub.f32 %v1551_v33, %v2262_v50 }
0x2ad2   :  { %1621 = vrot.lane.b32.xlu0 %v1619_v51, %s2304_s3 }
0x2b44   :  { %v1622_v54 = vpop.permute.xlu0 %1621 }
0x2b45   :  { %v1624_v43 = vmul.f32 %v2260_v47, %v1622_v54 }
0x2b47   :  { %1626 = vrot.lane.b32.xlu1 %v1624_v43, %s2305_s12 }
0x2bb9   :  { %v1627_v35 = vpop.permute.xlu1 %1626 }
0x2bba   :  { %v1629_v17 = vadd.f32 %v2262_v50, %v1627_v35 }
0x2bbc   :  { %v1631_v13 = vpack.c.bf16 %v1629_v17, %v1629_v17 }
0x2bbe   :  { %1633 = vrot.lane.b32.xlu0 %v1631_v13, %s2301_s26 }
0x2c30   :  { %v1634_v6 = vpop.permute.xlu0 %1633 }
0x2c31   :  { %2128 = vmatmul.mubr.msk.bf16.vlgmr.msra.gmra.mrb[32].mxu0 %vm182_vm2, %v1634_v6 }
0x2c32   :  { %2143 = vmatprep.mubr.msk.bf16.mxu0 %vm2300_vm0, %v2299_v1  ;;  %2140 = vmatpush3.bf16.msra.mxu0 %v2177_v37 }
0x2c33   :  { %2141 = vmatprep.subr.bf16.mxu0 %v2299_v1 }
0x2c36   :  { %2142 = vmatpush3.bf16.msra.mxu0 %v2178_v38 }
0x2d04   :  { %v1672_v7 = vpop.f32.mrb[32].mxu0 }
0x2d05   :  { %v1685_v55 = vadd.f32 %v1672_v7, %v2617_v9  ;;  %v2129_v56 = vpop.f32.mrb[33].mxu0  ;;  %v1678_v60 = vadd.f32 %v1672_v7, %v1630_v59 }
0x2d06   :  { %v1675_v57 = vpop.f32.mrb[34].mxu0 }
0x2d07   :  { %1687 = vrot.lane.b32.xlu1 %v1685_v55, %s2301_s26  ;;  %v2130_v58 = vpop.f32.mrb[35].mxu0  ;;  %v1934_v61 = vmul.f32 -1.442695, %v1678_v60 }
0x2d09   :  { %2263 = vpow2.f32 %v1934_v61 }
0x2d13   :  { %v2264_v62 = vpop.eup %2263 }
0x2d14   :  { %v1682_v63 = vadd.f32 1.0, %v2264_v62 }
0x2d16   :  { %2265 = vrcp.f32 %v1682_v63 }
0x2d20   :  { %v2266_v0 = vpop.eup %2265 }
0x2d79   :  { %v1688_v2 = vpop.permute.xlu1 %1687 }
0x2d7a   :  { %v1690_v3 = vmul.f32 %v2266_v0, %v1688_v2 }
0x2d7c   :  { %1692 = vrot.lane.b32.xlu0 %v1690_v3, %s2301_s26 }
0x2dee   :  { %v1693_v4 = vpop.permute.xlu0 %1692 }
0x2def   :  { %v1695_v5 = vadd.f32 %v1693_v4, %v1630_v59 }
0x2df1   :  { %2267 = vtanh.f32 %v1695_v5 }
0x2dfb   :  { %v2268_v8 = vpop.eup %2267 }
0x2dfc   :  { %v1697_v10 = vsub.f32 %v1629_v17, %v2268_v8 }
0x2dfe   :  { %1699 = vrot.lane.b32.xlu1 %v1697_v10, %s2304_s3 }
0x2e70   :  { %v1700_v11 = vpop.permute.xlu1 %1699 }
0x2e71   :  { %v1702_v12 = vmul.f32 %v2266_v0, %v1700_v11 }
0x2e73   :  { %1704 = vrot.lane.b32.xlu0 %v1702_v12, %s2305_s12 }
0x2ee5   :  { %v1705_v14 = vpop.permute.xlu0 %1704 }
0x2ee6   :  { %v1707_v15 = vadd.f32 %v2268_v8, %v1705_v14 }
0x2ee8   :  { %v1709_v16 = vpack.c.bf16 %v1707_v15, %v1707_v15 }
0x2eea   :  { %1711 = vrot.lane.b32.xlu1 %v1709_v16, %s2301_s26 }
0x2f5c   :  { %v1712_v18 = vpop.permute.xlu1 %1711 }
0x2f5d   :  { %2136 = vmatmul.mubr.msk.bf16.vlgmr.msra.gmra.mrb[32].mxu1 %vm182_vm2, %v1712_v18 }
0x3030   :  { %v1750_v19 = vpop.f32.mrb[32].mxu1 }
0x3031   :  { %v1763_v21 = vadd.f32 %v1750_v19, %v2617_v9  ;;  %v2137_v22 = vpop.f32.mrb[33].mxu1  ;;  %v1756_v26 = vadd.f32 %v1750_v19, %v1708_v25 }
0x3032   :  { %v1753_v23 = vpop.f32.mrb[34].mxu1 }
0x3033   :  { %1765 = vrot.lane.b32.xlu0 %v1763_v21, %s2301_s26  ;;  %v2138_v24 = vpop.f32.mrb[35].mxu1  ;;  %v1936_v27 = vmul.f32 -1.442695, %v1756_v26 }
0x3035   :  { %2269 = vpow2.f32 %v1936_v27 }
0x303f   :  { %v2270_v28 = vpop.eup %2269 }
0x3040   :  { %v1760_v29 = vadd.f32 1.0, %v2270_v28 }
0x3042   :  { %2271 = vrcp.f32 %v1760_v29 }
0x304c   :  { %v2272_v30 = vpop.eup %2271 }
0x30a5   :  { %v1766_v31 = vpop.permute.xlu0 %1765 }
0x30a6   :  { %v1768_v32 = vmul.f32 %v2272_v30, %v1766_v31 }
0x30a8   :  { %1770 = vrot.lane.b32.xlu1 %v1768_v32, %s2301_s26 }
0x311a   :  { %v1771_v33 = vpop.permute.xlu1 %1770 }
0x311b   :  { %v1773_v34 = vadd.f32 %v1771_v33, %v1708_v25 }
0x311d   :  { %2273 = vtanh.f32 %v1773_v34 }
0x3127   :  { %v2274_v9 = vpop.eup %2273 }
0x3128   :  { %v1775_v36 = vsub.f32 %v1707_v15, %v2274_v9 }
0x312a   :  { %1777 = vrot.lane.b32.xlu0 %v1775_v36, %s2304_s3 }
0x319c   :  { %v1778_v39 = vpop.permute.xlu0 %1777 }
0x319d   :  { %v1780_v40 = vmul.f32 %v2272_v30, %v1778_v39 }
0x319f   :  { %1782 = vrot.lane.b32.xlu1 %v1780_v40, %s2305_s12  ;;  %s2275_s12 = scalar_lea.vmem %s1864_s27, 32 }
0x31a0   :  { %p2276_p0 = scmp.ne.s32.totalorder %s1864_s27, %s2275_s12  ;;  %p2281_p2 = scmp.lt.s32.totalorder %s2275_s12, %s2275_s12 }
0x31a2   :  { %p2282_p3 = por %p2281_p2, %p2280_p1 }
0x31a4   :  { %p2283_p4 = pnand %p2282_p3, %p2276_p0 }
0x3211   :  { %v1783_v41 = vpop.permute.xlu1 %1782 }
0x3212   :  { %v1785_v42 = vadd.f32 %v2274_v9, %v1783_v41 }
0x3214   :  { %v1786_v44 = vpack.c.bf16 %v1785_v42, %v1785_v42 }
0x3216   :  { %1799 = vrot.lane.b32.xlu0 %v1786_v44, %s2301_s26 }
0x3288   :  { %v1800_v45 = vpop.permute.xlu0 %1799 }
0x3289   :  { %2144 = vmatmul.mubr.msk.bf16.vlgmr.msra.gmra.mrb[36].mxu0 %vm182_vm2, %v1800_v45 }
0x335c   :  { %v1850_v1 = vpop.f32.mrb[36].mxu0 }
0x335d   :  { %v1851_v46 = vadd.f32 %v1937_v52, %v1850_v1  ;;  %v2145_v47 = vpop.f32.mrb[37].mxu0 }
0x335e   :  { %v1853_v48 = vpop.f32.mrb[38].mxu0 }
0x335f   :  { %1856 = vst [vmem:[#allocation4] sm:$0x3] %v1851_v46  ;;  %v2146_v20 = vpop.f32.mrb[39].mxu0 }
0x3360   :  { %2286 = shalt.err (!%p2283_p4)
}
0x3361   :  { %s2287_s10 = scalar_lea.hbm %s2757_s11, 32 }
0x3362   :  { %p2288_p5 = scmp.ne.s32.totalorder %s2757_s11, %s2287_s10  ;;  %p2291_p6 = scmp.lt.u32.totalorder %s2287_s10, %s2757_s11 }
0x3364   :  { %p2293_p7 = pnand %p2291_p6, %p2288_p5 }
0x3366   :  { %2296 = shalt.err (!%p2293_p7)
}
0x3367   :  { %1866 = dma.vmem_to_hbm [thread:$0]  %s1864_s27, 32, %s2757_s11, [#allocation5]  }
0x3368   :  { %2297 = dma.done.wait [#allocation5], 32  }
0x3369   :  { %2298 = vsyncadd [#allocation5], 4294967264 }
0x336a   :  { %1870 = vsyncpa [#allocation5], 1 }

</bundles_post_ra>
